<compile_context>
chip_gen: v5e
topology: v5e:2x2
jax: 0.10.0
libtpu: 0.0.40
codegen_flags: <defaults>
</compile_context>

<pallas_src>
import functools

import jax
import jax.numpy as jnp
from jax.experimental import pallas as pl
from jax.experimental.pallas import tpu as pltpu


def _downsample_kernel(p_ref, w_ref, b_ref, o_ref, *, C, Npix, neg_slope):
    # p_ref: (9*C, Npix) VMEM  im2col tap slab, lane-dense.
    #        Row (t*C + ci), t = ky*3 + kx, holds xpad[n, ci, ky+2*oh, kx+2*ow]
    #        flattened over (n, oh, ow).
    # w_ref: (9*C*C,) SMEM     conv weights, flat in (ky, kx, ci, co) order.
    # b_ref: (C,)     SMEM     conv bias.
    # o_ref: (C, Npix) VMEM    lane-dense output slab (LeakyReLU applied).
    accs = [jnp.zeros((1, Npix), jnp.float32) + b_ref[co] for co in range(C)]
    for t in range(9):                      # 3x3 taps
        for ci in range(C):                 # input channels
            r = t * C + ci
            tap = p_ref[pl.ds(r, 1), :]     # one full-width (1, Npix) vld
            base = r * C
            for co in range(C):             # output channels (vreg accumulators)
                accs[co] = accs[co] + w_ref[base + co] * tap
    y = jnp.concatenate(accs, axis=0)       # (C, Npix)
    o_ref[...] = jnp.maximum(y, neg_slope * y)   # LeakyReLU, single store


def downsampling(x, w, b, *, neg_slope=0.01):
    """DownSampling forward: Conv2d(C, C, 3, stride=2, pad=1) -> LeakyReLU(0.01).

    x: (N, C, H, W) float32 with H, W even.  Returns (N, C, H//2, W//2).
    """
    N, C, H, W = x.shape
    assert w.shape == (C, C, 3, 3) and b.shape == (C,)
    # TODO(synk): odd spatial sizes (supported by PyTorch's stride-2/pad-1 conv)
    # are not handled here.
    assert H % 2 == 0 and W % 2 == 0, "even spatial dims expected"
    Ho, Wo = H // 2, W // 2
    Npix = N * Ho * Wo

    # ---- wrapper-side layout plumbing (one small fused XLA op) --------------
    # Zero-pad by 1 and extract the 9 stride-2 tap windows directly into the
    # lane-dense (9*C, N*Ho*Wo) im2col layout the kernel consumes.
    xf = x.astype(jnp.float32)
    xp = jnp.pad(xf, ((0, 0), (0, 0), (1, 1), (1, 1)))        # (N, C, H+2, W+2)
    taps = jnp.stack(
        [xp[:, :, ky:ky + 2 * Ho:2, kx:kx + 2 * Wo:2]
         for ky in range(3) for kx in range(3)], axis=0)      # (9, N, C, Ho, Wo)
    patches = jnp.transpose(taps, (0, 2, 1, 3, 4)).reshape(9 * C, Npix)

    # Weights flattened in (ky, kx, ci, co) order for SMEM scalar reads.
    w_flat = jnp.transpose(w, (2, 3, 1, 0)).reshape(-1).astype(jnp.float32)

    kernel = functools.partial(_downsample_kernel, C=C, Npix=Npix,
                               neg_slope=neg_slope)
    smem = pl.BlockSpec(memory_space=pltpu.MemorySpace.SMEM)
    vmem = pl.BlockSpec(memory_space=pltpu.MemorySpace.VMEM)

    y = pl.pallas_call(
        kernel,
        out_shape=jax.ShapeDtypeStruct((C, Npix), jnp.float32),
        in_specs=[vmem, smem, smem],     # patches / weights / bias, single step
        out_specs=vmem,
    )(patches, w_flat, b.astype(jnp.float32))

    # Layout plumbing back to NCHW: (C, N*Ho*Wo) -> (N, C, Ho, Wo).
    return jnp.transpose(y.reshape(C, N, Ho, Wo), (1, 0, 2, 3))


if __name__ == "__main__":
    key = jax.random.PRNGKey(0)
    kx_, kw_, kb_ = jax.random.split(key, 3)

    N, C, H, W = 2, 4, 16, 16
    x = jax.random.normal(kx_, (N, C, H, W), jnp.float32)

    # PyTorch-style Conv2d init (uniform +- 1/sqrt(fan_in))
    fan_in = C * 3 * 3
    bound = 1.0 / float(jnp.sqrt(jnp.float32(fan_in)))
    w = jax.random.uniform(kw_, (C, C, 3, 3), jnp.float32,
                           minval=-bound, maxval=bound)
    b = jax.random.uniform(kb_, (C,), jnp.float32, minval=-bound, maxval=bound)

    y = jax.block_until_ready(downsampling(x, w, b))

    # Pure-JAX reference: Conv2d(C, C, 3, stride=2, pad=1) + LeakyReLU(0.01)
    y_ref = jax.lax.conv_general_dilated(
        x, w, window_strides=(2, 2), padding=((1, 1), (1, 1)),
        dimension_numbers=("NCHW", "OIHW", "NCHW"))
    y_ref = y_ref + b[None, :, None, None]
    y_ref = jnp.where(y_ref >= 0.0, y_ref, 0.01 * y_ref)

    assert y.shape == (N, C, H // 2, W // 2)
    assert jnp.allclose(y, y_ref, atol=1e-5, rtol=1e-5), \
        float(jnp.max(jnp.abs(y - y_ref)))

    print("KERNEL_OK")
</pallas_src>

<mosaic_0001>
module attributes {stable_mosaic.version = 11 : i64} {
  func.func @_downsample_kernel(%arg0: memref<36x128xf32, #tpu.memory_space<vmem>>, %arg1: memref<144xf32, #tpu.memory_space<smem>>, %arg2: memref<4xf32, #tpu.memory_space<smem>>, %arg3: memref<4x128xf32, #tpu.memory_space<vmem>>) attributes {dimension_semantics = [], scalar_prefetch = 0 : i64, scratch_operands = 0 : i64, tpu.core_type = #tpu.core_type<tc>} {
    %cst = arith.constant 0.000000e+00 : f32
    %0 = vector.broadcast %cst : f32 to vector<1x128xf32>
    %c0 = arith.constant 0 : index
    %1 = memref.load %arg2[%c0] : memref<4xf32, #tpu.memory_space<smem>>
    %2 = vector.broadcast %1 : f32 to vector<1x128xf32>
    %3 = arith.addf %0, %2 : vector<1x128xf32>
    %cst_0 = arith.constant 0.000000e+00 : f32
    %4 = vector.broadcast %cst_0 : f32 to vector<1x128xf32>
    %c1 = arith.constant 1 : index
    %5 = memref.load %arg2[%c1] : memref<4xf32, #tpu.memory_space<smem>>
    %6 = vector.broadcast %5 : f32 to vector<1x128xf32>
    %7 = arith.addf %4, %6 : vector<1x128xf32>
    %cst_1 = arith.constant 0.000000e+00 : f32
    %8 = vector.broadcast %cst_1 : f32 to vector<1x128xf32>
    %c2 = arith.constant 2 : index
    %9 = memref.load %arg2[%c2] : memref<4xf32, #tpu.memory_space<smem>>
    %10 = vector.broadcast %9 : f32 to vector<1x128xf32>
    %11 = arith.addf %8, %10 : vector<1x128xf32>
    %cst_2 = arith.constant 0.000000e+00 : f32
    %12 = vector.broadcast %cst_2 : f32 to vector<1x128xf32>
    %c3 = arith.constant 3 : index
    %13 = memref.load %arg2[%c3] : memref<4xf32, #tpu.memory_space<smem>>
    %14 = vector.broadcast %13 : f32 to vector<1x128xf32>
    %15 = arith.addf %12, %14 : vector<1x128xf32>
    %c0_3 = arith.constant 0 : index
    %c0_4 = arith.constant 0 : index
    %16 = vector.load %arg0[%c0_3, %c0_4] : memref<36x128xf32, #tpu.memory_space<vmem>>, vector<1x128xf32>
    %c0_5 = arith.constant 0 : index
    %17 = memref.load %arg1[%c0_5] : memref<144xf32, #tpu.memory_space<smem>>
    %18 = vector.broadcast %17 : f32 to vector<1x128xf32>
    %19 = arith.mulf %18, %16 : vector<1x128xf32>
    %20 = arith.addf %3, %19 : vector<1x128xf32>
    %c1_6 = arith.constant 1 : index
    %21 = memref.load %arg1[%c1_6] : memref<144xf32, #tpu.memory_space<smem>>
    %22 = vector.broadcast %21 : f32 to vector<1x128xf32>
    %23 = arith.mulf %22, %16 : vector<1x128xf32>
    %24 = arith.addf %7, %23 : vector<1x128xf32>
    %c2_7 = arith.constant 2 : index
    %25 = memref.load %arg1[%c2_7] : memref<144xf32, #tpu.memory_space<smem>>
    %26 = vector.broadcast %25 : f32 to vector<1x128xf32>
    %27 = arith.mulf %26, %16 : vector<1x128xf32>
    %28 = arith.addf %11, %27 : vector<1x128xf32>
    %c3_8 = arith.constant 3 : index
    %29 = memref.load %arg1[%c3_8] : memref<144xf32, #tpu.memory_space<smem>>
    %30 = vector.broadcast %29 : f32 to vector<1x128xf32>
    %31 = arith.mulf %30, %16 : vector<1x128xf32>
    %32 = arith.addf %15, %31 : vector<1x128xf32>
    %c1_9 = arith.constant 1 : index
    %c0_10 = arith.constant 0 : index
    %33 = vector.load %arg0[%c1_9, %c0_10] : memref<36x128xf32, #tpu.memory_space<vmem>>, vector<1x128xf32>
    %c4 = arith.constant 4 : index
    %34 = memref.load %arg1[%c4] : memref<144xf32, #tpu.memory_space<smem>>
    %35 = vector.broadcast %34 : f32 to vector<1x128xf32>
    %36 = arith.mulf %35, %33 : vector<1x128xf32>
    %37 = arith.addf %20, %36 : vector<1x128xf32>
    %c5 = arith.constant 5 : index
    %38 = memref.load %arg1[%c5] : memref<144xf32, #tpu.memory_space<smem>>
    %39 = vector.broadcast %38 : f32 to vector<1x128xf32>
    %40 = arith.mulf %39, %33 : vector<1x128xf32>
    %41 = arith.addf %24, %40 : vector<1x128xf32>
    %c6 = arith.constant 6 : index
    %42 = memref.load %arg1[%c6] : memref<144xf32, #tpu.memory_space<smem>>
    %43 = vector.broadcast %42 : f32 to vector<1x128xf32>
    %44 = arith.mulf %43, %33 : vector<1x128xf32>
    %45 = arith.addf %28, %44 : vector<1x128xf32>
    %c7 = arith.constant 7 : index
    %46 = memref.load %arg1[%c7] : memref<144xf32, #tpu.memory_space<smem>>
    %47 = vector.broadcast %46 : f32 to vector<1x128xf32>
    %48 = arith.mulf %47, %33 : vector<1x128xf32>
    %49 = arith.addf %32, %48 : vector<1x128xf32>
    %c2_11 = arith.constant 2 : index
    %c0_12 = arith.constant 0 : index
    %50 = vector.load %arg0[%c2_11, %c0_12] : memref<36x128xf32, #tpu.memory_space<vmem>>, vector<1x128xf32>
    %c8 = arith.constant 8 : index
    %51 = memref.load %arg1[%c8] : memref<144xf32, #tpu.memory_space<smem>>
    %52 = vector.broadcast %51 : f32 to vector<1x128xf32>
    %53 = arith.mulf %52, %50 : vector<1x128xf32>
    %54 = arith.addf %37, %53 : vector<1x128xf32>
    %c9 = arith.constant 9 : index
    %55 = memref.load %arg1[%c9] : memref<144xf32, #tpu.memory_space<smem>>
    %56 = vector.broadcast %55 : f32 to vector<1x128xf32>
    %57 = arith.mulf %56, %50 : vector<1x128xf32>
    %58 = arith.addf %41, %57 : vector<1x128xf32>
    %c10 = arith.constant 10 : index
    %59 = memref.load %arg1[%c10] : memref<144xf32, #tpu.memory_space<smem>>
    %60 = vector.broadcast %59 : f32 to vector<1x128xf32>
    %61 = arith.mulf %60, %50 : vector<1x128xf32>
    %62 = arith.addf %45, %61 : vector<1x128xf32>
    %c11 = arith.constant 11 : index
    %63 = memref.load %arg1[%c11] : memref<144xf32, #tpu.memory_space<smem>>
    %64 = vector.broadcast %63 : f32 to vector<1x128xf32>
    %65 = arith.mulf %64, %50 : vector<1x128xf32>
    %66 = arith.addf %49, %65 : vector<1x128xf32>
    %c3_13 = arith.constant 3 : index
    %c0_14 = arith.constant 0 : index
    %67 = vector.load %arg0[%c3_13, %c0_14] : memref<36x128xf32, #tpu.memory_space<vmem>>, vector<1x128xf32>
    %c12 = arith.constant 12 : index
    %68 = memref.load %arg1[%c12] : memref<144xf32, #tpu.memory_space<smem>>
    %69 = vector.broadcast %68 : f32 to vector<1x128xf32>
    %70 = arith.mulf %69, %67 : vector<1x128xf32>
    %71 = arith.addf %54, %70 : vector<1x128xf32>
    %c13 = arith.constant 13 : index
    %72 = memref.load %arg1[%c13] : memref<144xf32, #tpu.memory_space<smem>>
    %73 = vector.broadcast %72 : f32 to vector<1x128xf32>
    %74 = arith.mulf %73, %67 : vector<1x128xf32>
    %75 = arith.addf %58, %74 : vector<1x128xf32>
    %c14 = arith.constant 14 : index
    %76 = memref.load %arg1[%c14] : memref<144xf32, #tpu.memory_space<smem>>
    %77 = vector.broadcast %76 : f32 to vector<1x128xf32>
    %78 = arith.mulf %77, %67 : vector<1x128xf32>
    %79 = arith.addf %62, %78 : vector<1x128xf32>
    %c15 = arith.constant 15 : index
    %80 = memref.load %arg1[%c15] : memref<144xf32, #tpu.memory_space<smem>>
    %81 = vector.broadcast %80 : f32 to vector<1x128xf32>
    %82 = arith.mulf %81, %67 : vector<1x128xf32>
    %83 = arith.addf %66, %82 : vector<1x128xf32>
    %c4_15 = arith.constant 4 : index
    %c0_16 = arith.constant 0 : index
    %84 = vector.load %arg0[%c4_15, %c0_16] : memref<36x128xf32, #tpu.memory_space<vmem>>, vector<1x128xf32>
    %c16 = arith.constant 16 : index
    %85 = memref.load %arg1[%c16] : memref<144xf32, #tpu.memory_space<smem>>
    %86 = vector.broadcast %85 : f32 to vector<1x128xf32>
    %87 = arith.mulf %86, %84 : vector<1x128xf32>
    %88 = arith.addf %71, %87 : vector<1x128xf32>
    %c17 = arith.constant 17 : index
    %89 = memref.load %arg1[%c17] : memref<144xf32, #tpu.memory_space<smem>>
    %90 = vector.broadcast %89 : f32 to vector<1x128xf32>
    %91 = arith.mulf %90, %84 : vector<1x128xf32>
    %92 = arith.addf %75, %91 : vector<1x128xf32>
    %c18 = arith.constant 18 : index
    %93 = memref.load %arg1[%c18] : memref<144xf32, #tpu.memory_space<smem>>
    %94 = vector.broadcast %93 : f32 to vector<1x128xf32>
    %95 = arith.mulf %94, %84 : vector<1x128xf32>
    %96 = arith.addf %79, %95 : vector<1x128xf32>
    %c19 = arith.constant 19 : index
    %97 = memref.load %arg1[%c19] : memref<144xf32, #tpu.memory_space<smem>>
    %98 = vector.broadcast %97 : f32 to vector<1x128xf32>
    %99 = arith.mulf %98, %84 : vector<1x128xf32>
    %100 = arith.addf %83, %99 : vector<1x128xf32>
    %c5_17 = arith.constant 5 : index
    %c0_18 = arith.constant 0 : index
    %101 = vector.load %arg0[%c5_17, %c0_18] : memref<36x128xf32, #tpu.memory_space<vmem>>, vector<1x128xf32>
    %c20 = arith.constant 20 : index
    %102 = memref.load %arg1[%c20] : memref<144xf32, #tpu.memory_space<smem>>
    %103 = vector.broadcast %102 : f32 to vector<1x128xf32>
    %104 = arith.mulf %103, %101 : vector<1x128xf32>
    %105 = arith.addf %88, %104 : vector<1x128xf32>
    %c21 = arith.constant 21 : index
    %106 = memref.load %arg1[%c21] : memref<144xf32, #tpu.memory_space<smem>>
    %107 = vector.broadcast %106 : f32 to vector<1x128xf32>
    %108 = arith.mulf %107, %101 : vector<1x128xf32>
    %109 = arith.addf %92, %108 : vector<1x128xf32>
    %c22 = arith.constant 22 : index
    %110 = memref.load %arg1[%c22] : memref<144xf32, #tpu.memory_space<smem>>
    %111 = vector.broadcast %110 : f32 to vector<1x128xf32>
    %112 = arith.mulf %111, %101 : vector<1x128xf32>
    %113 = arith.addf %96, %112 : vector<1x128xf32>
    %c23 = arith.constant 23 : index
    %114 = memref.load %arg1[%c23] : memref<144xf32, #tpu.memory_space<smem>>
    %115 = vector.broadcast %114 : f32 to vector<1x128xf32>
    %116 = arith.mulf %115, %101 : vector<1x128xf32>
    %117 = arith.addf %100, %116 : vector<1x128xf32>
    %c6_19 = arith.constant 6 : index
    %c0_20 = arith.constant 0 : index
    %118 = vector.load %arg0[%c6_19, %c0_20] : memref<36x128xf32, #tpu.memory_space<vmem>>, vector<1x128xf32>
    %c24 = arith.constant 24 : index
    %119 = memref.load %arg1[%c24] : memref<144xf32, #tpu.memory_space<smem>>
    %120 = vector.broadcast %119 : f32 to vector<1x128xf32>
    %121 = arith.mulf %120, %118 : vector<1x128xf32>
    %122 = arith.addf %105, %121 : vector<1x128xf32>
    %c25 = arith.constant 25 : index
    %123 = memref.load %arg1[%c25] : memref<144xf32, #tpu.memory_space<smem>>
    %124 = vector.broadcast %123 : f32 to vector<1x128xf32>
    %125 = arith.mulf %124, %118 : vector<1x128xf32>
    %126 = arith.addf %109, %125 : vector<1x128xf32>
    %c26 = arith.constant 26 : index
    %127 = memref.load %arg1[%c26] : memref<144xf32, #tpu.memory_space<smem>>
    %128 = vector.broadcast %127 : f32 to vector<1x128xf32>
    %129 = arith.mulf %128, %118 : vector<1x128xf32>
    %130 = arith.addf %113, %129 : vector<1x128xf32>
    %c27 = arith.constant 27 : index
    %131 = memref.load %arg1[%c27] : memref<144xf32, #tpu.memory_space<smem>>
    %132 = vector.broadcast %131 : f32 to vector<1x128xf32>
    %133 = arith.mulf %132, %118 : vector<1x128xf32>
    %134 = arith.addf %117, %133 : vector<1x128xf32>
    %c7_21 = arith.constant 7 : index
    %c0_22 = arith.constant 0 : index
    %135 = vector.load %arg0[%c7_21, %c0_22] : memref<36x128xf32, #tpu.memory_space<vmem>>, vector<1x128xf32>
    %c28 = arith.constant 28 : index
    %136 = memref.load %arg1[%c28] : memref<144xf32, #tpu.memory_space<smem>>
    %137 = vector.broadcast %136 : f32 to vector<1x128xf32>
    %138 = arith.mulf %137, %135 : vector<1x128xf32>
    %139 = arith.addf %122, %138 : vector<1x128xf32>
    %c29 = arith.constant 29 : index
    %140 = memref.load %arg1[%c29] : memref<144xf32, #tpu.memory_space<smem>>
    %141 = vector.broadcast %140 : f32 to vector<1x128xf32>
    %142 = arith.mulf %141, %135 : vector<1x128xf32>
    %143 = arith.addf %126, %142 : vector<1x128xf32>
    %c30 = arith.constant 30 : index
    %144 = memref.load %arg1[%c30] : memref<144xf32, #tpu.memory_space<smem>>
    %145 = vector.broadcast %144 : f32 to vector<1x128xf32>
    %146 = arith.mulf %145, %135 : vector<1x128xf32>
    %147 = arith.addf %130, %146 : vector<1x128xf32>
    %c31 = arith.constant 31 : index
    %148 = memref.load %arg1[%c31] : memref<144xf32, #tpu.memory_space<smem>>
    %149 = vector.broadcast %148 : f32 to vector<1x128xf32>
    %150 = arith.mulf %149, %135 : vector<1x128xf32>
    %151 = arith.addf %134, %150 : vector<1x128xf32>
    %c8_23 = arith.constant 8 : index
    %c0_24 = arith.constant 0 : index
    %152 = vector.load %arg0[%c8_23, %c0_24] : memref<36x128xf32, #tpu.memory_space<vmem>>, vector<1x128xf32>
    %c32 = arith.constant 32 : index
    %153 = memref.load %arg1[%c32] : memref<144xf32, #tpu.memory_space<smem>>
    %154 = vector.broadcast %153 : f32 to vector<1x128xf32>
    %155 = arith.mulf %154, %152 : vector<1x128xf32>
    %156 = arith.addf %139, %155 : vector<1x128xf32>
    %c33 = arith.constant 33 : index
    %157 = memref.load %arg1[%c33] : memref<144xf32, #tpu.memory_space<smem>>
    %158 = vector.broadcast %157 : f32 to vector<1x128xf32>
    %159 = arith.mulf %158, %152 : vector<1x128xf32>
    %160 = arith.addf %143, %159 : vector<1x128xf32>
    %c34 = arith.constant 34 : index
    %161 = memref.load %arg1[%c34] : memref<144xf32, #tpu.memory_space<smem>>
    %162 = vector.broadcast %161 : f32 to vector<1x128xf32>
    %163 = arith.mulf %162, %152 : vector<1x128xf32>
    %164 = arith.addf %147, %163 : vector<1x128xf32>
    %c35 = arith.constant 35 : index
    %165 = memref.load %arg1[%c35] : memref<144xf32, #tpu.memory_space<smem>>
    %166 = vector.broadcast %165 : f32 to vector<1x128xf32>
    %167 = arith.mulf %166, %152 : vector<1x128xf32>
    %168 = arith.addf %151, %167 : vector<1x128xf32>
    %c9_25 = arith.constant 9 : index
    %c0_26 = arith.constant 0 : index
    %169 = vector.load %arg0[%c9_25, %c0_26] : memref<36x128xf32, #tpu.memory_space<vmem>>, vector<1x128xf32>
    %c36 = arith.constant 36 : index
    %170 = memref.load %arg1[%c36] : memref<144xf32, #tpu.memory_space<smem>>
    %171 = vector.broadcast %170 : f32 to vector<1x128xf32>
    %172 = arith.mulf %171, %169 : vector<1x128xf32>
    %173 = arith.addf %156, %172 : vector<1x128xf32>
    %c37 = arith.constant 37 : index
    %174 = memref.load %arg1[%c37] : memref<144xf32, #tpu.memory_space<smem>>
    %175 = vector.broadcast %174 : f32 to vector<1x128xf32>
    %176 = arith.mulf %175, %169 : vector<1x128xf32>
    %177 = arith.addf %160, %176 : vector<1x128xf32>
    %c38 = arith.constant 38 : index
    %178 = memref.load %arg1[%c38] : memref<144xf32, #tpu.memory_space<smem>>
    %179 = vector.broadcast %178 : f32 to vector<1x128xf32>
    %180 = arith.mulf %179, %169 : vector<1x128xf32>
    %181 = arith.addf %164, %180 : vector<1x128xf32>
    %c39 = arith.constant 39 : index
    %182 = memref.load %arg1[%c39] : memref<144xf32, #tpu.memory_space<smem>>
    %183 = vector.broadcast %182 : f32 to vector<1x128xf32>
    %184 = arith.mulf %183, %169 : vector<1x128xf32>
    %185 = arith.addf %168, %184 : vector<1x128xf32>
    %c10_27 = arith.constant 10 : index
    %c0_28 = arith.constant 0 : index
    %186 = vector.load %arg0[%c10_27, %c0_28] : memref<36x128xf32, #tpu.memory_space<vmem>>, vector<1x128xf32>
    %c40 = arith.constant 40 : index
    %187 = memref.load %arg1[%c40] : memref<144xf32, #tpu.memory_space<smem>>
    %188 = vector.broadcast %187 : f32 to vector<1x128xf32>
    %189 = arith.mulf %188, %186 : vector<1x128xf32>
    %190 = arith.addf %173, %189 : vector<1x128xf32>
    %c41 = arith.constant 41 : index
    %191 = memref.load %arg1[%c41] : memref<144xf32, #tpu.memory_space<smem>>
    %192 = vector.broadcast %191 : f32 to vector<1x128xf32>
    %193 = arith.mulf %192, %186 : vector<1x128xf32>
    %194 = arith.addf %177, %193 : vector<1x128xf32>
    %c42 = arith.constant 42 : index
    %195 = memref.load %arg1[%c42] : memref<144xf32, #tpu.memory_space<smem>>
    %196 = vector.broadcast %195 : f32 to vector<1x128xf32>
    %197 = arith.mulf %196, %186 : vector<1x128xf32>
    %198 = arith.addf %181, %197 : vector<1x128xf32>
    %c43 = arith.constant 43 : index
    %199 = memref.load %arg1[%c43] : memref<144xf32, #tpu.memory_space<smem>>
    %200 = vector.broadcast %199 : f32 to vector<1x128xf32>
    %201 = arith.mulf %200, %186 : vector<1x128xf32>
    %202 = arith.addf %185, %201 : vector<1x128xf32>
    %c11_29 = arith.constant 11 : index
    %c0_30 = arith.constant 0 : index
    %203 = vector.load %arg0[%c11_29, %c0_30] : memref<36x128xf32, #tpu.memory_space<vmem>>, vector<1x128xf32>
    %c44 = arith.constant 44 : index
    %204 = memref.load %arg1[%c44] : memref<144xf32, #tpu.memory_space<smem>>
    %205 = vector.broadcast %204 : f32 to vector<1x128xf32>
    %206 = arith.mulf %205, %203 : vector<1x128xf32>
    %207 = arith.addf %190, %206 : vector<1x128xf32>
    %c45 = arith.constant 45 : index
    %208 = memref.load %arg1[%c45] : memref<144xf32, #tpu.memory_space<smem>>
    %209 = vector.broadcast %208 : f32 to vector<1x128xf32>
    %210 = arith.mulf %209, %203 : vector<1x128xf32>
    %211 = arith.addf %194, %210 : vector<1x128xf32>
    %c46 = arith.constant 46 : index
    %212 = memref.load %arg1[%c46] : memref<144xf32, #tpu.memory_space<smem>>
    %213 = vector.broadcast %212 : f32 to vector<1x128xf32>
    %214 = arith.mulf %213, %203 : vector<1x128xf32>
    %215 = arith.addf %198, %214 : vector<1x128xf32>
    %c47 = arith.constant 47 : index
    %216 = memref.load %arg1[%c47] : memref<144xf32, #tpu.memory_space<smem>>
    %217 = vector.broadcast %216 : f32 to vector<1x128xf32>
    %218 = arith.mulf %217, %203 : vector<1x128xf32>
    %219 = arith.addf %202, %218 : vector<1x128xf32>
    %c12_31 = arith.constant 12 : index
    %c0_32 = arith.constant 0 : index
    %220 = vector.load %arg0[%c12_31, %c0_32] : memref<36x128xf32, #tpu.memory_space<vmem>>, vector<1x128xf32>
    %c48 = arith.constant 48 : index
    %221 = memref.load %arg1[%c48] : memref<144xf32, #tpu.memory_space<smem>>
    %222 = vector.broadcast %221 : f32 to vector<1x128xf32>
    %223 = arith.mulf %222, %220 : vector<1x128xf32>
    %224 = arith.addf %207, %223 : vector<1x128xf32>
    %c49 = arith.constant 49 : index
    %225 = memref.load %arg1[%c49] : memref<144xf32, #tpu.memory_space<smem>>
    %226 = vector.broadcast %225 : f32 to vector<1x128xf32>
    %227 = arith.mulf %226, %220 : vector<1x128xf32>
    %228 = arith.addf %211, %227 : vector<1x128xf32>
    %c50 = arith.constant 50 : index
    %229 = memref.load %arg1[%c50] : memref<144xf32, #tpu.memory_space<smem>>
    %230 = vector.broadcast %229 : f32 to vector<1x128xf32>
    %231 = arith.mulf %230, %220 : vector<1x128xf32>
    %232 = arith.addf %215, %231 : vector<1x128xf32>
    %c51 = arith.constant 51 : index
    %233 = memref.load %arg1[%c51] : memref<144xf32, #tpu.memory_space<smem>>
    %234 = vector.broadcast %233 : f32 to vector<1x128xf32>
    %235 = arith.mulf %234, %220 : vector<1x128xf32>
    %236 = arith.addf %219, %235 : vector<1x128xf32>
    %c13_33 = arith.constant 13 : index
    %c0_34 = arith.constant 0 : index
    %237 = vector.load %arg0[%c13_33, %c0_34] : memref<36x128xf32, #tpu.memory_space<vmem>>, vector<1x128xf32>
    %c52 = arith.constant 52 : index
    %238 = memref.load %arg1[%c52] : memref<144xf32, #tpu.memory_space<smem>>
    %239 = vector.broadcast %238 : f32 to vector<1x128xf32>
    %240 = arith.mulf %239, %237 : vector<1x128xf32>
    %241 = arith.addf %224, %240 : vector<1x128xf32>
    %c53 = arith.constant 53 : index
    %242 = memref.load %arg1[%c53] : memref<144xf32, #tpu.memory_space<smem>>
    %243 = vector.broadcast %242 : f32 to vector<1x128xf32>
    %244 = arith.mulf %243, %237 : vector<1x128xf32>
    %245 = arith.addf %228, %244 : vector<1x128xf32>
    %c54 = arith.constant 54 : index
    %246 = memref.load %arg1[%c54] : memref<144xf32, #tpu.memory_space<smem>>
    %247 = vector.broadcast %246 : f32 to vector<1x128xf32>
    %248 = arith.mulf %247, %237 : vector<1x128xf32>
    %249 = arith.addf %232, %248 : vector<1x128xf32>
    %c55 = arith.constant 55 : index
    %250 = memref.load %arg1[%c55] : memref<144xf32, #tpu.memory_space<smem>>
    %251 = vector.broadcast %250 : f32 to vector<1x128xf32>
    %252 = arith.mulf %251, %237 : vector<1x128xf32>
    %253 = arith.addf %236, %252 : vector<1x128xf32>
    %c14_35 = arith.constant 14 : index
    %c0_36 = arith.constant 0 : index
    %254 = vector.load %arg0[%c14_35, %c0_36] : memref<36x128xf32, #tpu.memory_space<vmem>>, vector<1x128xf32>
    %c56 = arith.constant 56 : index
    %255 = memref.load %arg1[%c56] : memref<144xf32, #tpu.memory_space<smem>>
    %256 = vector.broadcast %255 : f32 to vector<1x128xf32>
    %257 = arith.mulf %256, %254 : vector<1x128xf32>
    %258 = arith.addf %241, %257 : vector<1x128xf32>
    %c57 = arith.constant 57 : index
    %259 = memref.load %arg1[%c57] : memref<144xf32, #tpu.memory_space<smem>>
    %260 = vector.broadcast %259 : f32 to vector<1x128xf32>
    %261 = arith.mulf %260, %254 : vector<1x128xf32>
    %262 = arith.addf %245, %261 : vector<1x128xf32>
    %c58 = arith.constant 58 : index
    %263 = memref.load %arg1[%c58] : memref<144xf32, #tpu.memory_space<smem>>
    %264 = vector.broadcast %263 : f32 to vector<1x128xf32>
    %265 = arith.mulf %264, %254 : vector<1x128xf32>
    %266 = arith.addf %249, %265 : vector<1x128xf32>
    %c59 = arith.constant 59 : index
    %267 = memref.load %arg1[%c59] : memref<144xf32, #tpu.memory_space<smem>>
    %268 = vector.broadcast %267 : f32 to vector<1x128xf32>
    %269 = arith.mulf %268, %254 : vector<1x128xf32>
    %270 = arith.addf %253, %269 : vector<1x128xf32>
    %c15_37 = arith.constant 15 : index
    %c0_38 = arith.constant 0 : index
    %271 = vector.load %arg0[%c15_37, %c0_38] : memref<36x128xf32, #tpu.memory_space<vmem>>, vector<1x128xf32>
    %c60 = arith.constant 60 : index
    %272 = memref.load %arg1[%c60] : memref<144xf32, #tpu.memory_space<smem>>
    %273 = vector.broadcast %272 : f32 to vector<1x128xf32>
    %274 = arith.mulf %273, %271 : vector<1x128xf32>
    %275 = arith.addf %258, %274 : vector<1x128xf32>
    %c61 = arith.constant 61 : index
    %276 = memref.load %arg1[%c61] : memref<144xf32, #tpu.memory_space<smem>>
    %277 = vector.broadcast %276 : f32 to vector<1x128xf32>
    %278 = arith.mulf %277, %271 : vector<1x128xf32>
    %279 = arith.addf %262, %278 : vector<1x128xf32>
    %c62 = arith.constant 62 : index
    %280 = memref.load %arg1[%c62] : memref<144xf32, #tpu.memory_space<smem>>
    %281 = vector.broadcast %280 : f32 to vector<1x128xf32>
    %282 = arith.mulf %281, %271 : vector<1x128xf32>
    %283 = arith.addf %266, %282 : vector<1x128xf32>
    %c63 = arith.constant 63 : index
    %284 = memref.load %arg1[%c63] : memref<144xf32, #tpu.memory_space<smem>>
    %285 = vector.broadcast %284 : f32 to vector<1x128xf32>
    %286 = arith.mulf %285, %271 : vector<1x128xf32>
    %287 = arith.addf %270, %286 : vector<1x128xf32>
    %c16_39 = arith.constant 16 : index
    %c0_40 = arith.constant 0 : index
    %288 = vector.load %arg0[%c16_39, %c0_40] : memref<36x128xf32, #tpu.memory_space<vmem>>, vector<1x128xf32>
    %c64 = arith.constant 64 : index
    %289 = memref.load %arg1[%c64] : memref<144xf32, #tpu.memory_space<smem>>
    %290 = vector.broadcast %289 : f32 to vector<1x128xf32>
    %291 = arith.mulf %290, %288 : vector<1x128xf32>
    %292 = arith.addf %275, %291 : vector<1x128xf32>
    %c65 = arith.constant 65 : index
    %293 = memref.load %arg1[%c65] : memref<144xf32, #tpu.memory_space<smem>>
    %294 = vector.broadcast %293 : f32 to vector<1x128xf32>
    %295 = arith.mulf %294, %288 : vector<1x128xf32>
    %296 = arith.addf %279, %295 : vector<1x128xf32>
    %c66 = arith.constant 66 : index
    %297 = memref.load %arg1[%c66] : memref<144xf32, #tpu.memory_space<smem>>
    %298 = vector.broadcast %297 : f32 to vector<1x128xf32>
    %299 = arith.mulf %298, %288 : vector<1x128xf32>
    %300 = arith.addf %283, %299 : vector<1x128xf32>
    %c67 = arith.constant 67 : index
    %301 = memref.load %arg1[%c67] : memref<144xf32, #tpu.memory_space<smem>>
    %302 = vector.broadcast %301 : f32 to vector<1x128xf32>
    %303 = arith.mulf %302, %288 : vector<1x128xf32>
    %304 = arith.addf %287, %303 : vector<1x128xf32>
    %c17_41 = arith.constant 17 : index
    %c0_42 = arith.constant 0 : index
    %305 = vector.load %arg0[%c17_41, %c0_42] : memref<36x128xf32, #tpu.memory_space<vmem>>, vector<1x128xf32>
    %c68 = arith.constant 68 : index
    %306 = memref.load %arg1[%c68] : memref<144xf32, #tpu.memory_space<smem>>
    %307 = vector.broadcast %306 : f32 to vector<1x128xf32>
    %308 = arith.mulf %307, %305 : vector<1x128xf32>
    %309 = arith.addf %292, %308 : vector<1x128xf32>
    %c69 = arith.constant 69 : index
    %310 = memref.load %arg1[%c69] : memref<144xf32, #tpu.memory_space<smem>>
    %311 = vector.broadcast %310 : f32 to vector<1x128xf32>
    %312 = arith.mulf %311, %305 : vector<1x128xf32>
    %313 = arith.addf %296, %312 : vector<1x128xf32>
    %c70 = arith.constant 70 : index
    %314 = memref.load %arg1[%c70] : memref<144xf32, #tpu.memory_space<smem>>
    %315 = vector.broadcast %314 : f32 to vector<1x128xf32>
    %316 = arith.mulf %315, %305 : vector<1x128xf32>
    %317 = arith.addf %300, %316 : vector<1x128xf32>
    %c71 = arith.constant 71 : index
    %318 = memref.load %arg1[%c71] : memref<144xf32, #tpu.memory_space<smem>>
    %319 = vector.broadcast %318 : f32 to vector<1x128xf32>
    %320 = arith.mulf %319, %305 : vector<1x128xf32>
    %321 = arith.addf %304, %320 : vector<1x128xf32>
    %c18_43 = arith.constant 18 : index
    %c0_44 = arith.constant 0 : index
    %322 = vector.load %arg0[%c18_43, %c0_44] : memref<36x128xf32, #tpu.memory_space<vmem>>, vector<1x128xf32>
    %c72 = arith.constant 72 : index
    %323 = memref.load %arg1[%c72] : memref<144xf32, #tpu.memory_space<smem>>
    %324 = vector.broadcast %323 : f32 to vector<1x128xf32>
    %325 = arith.mulf %324, %322 : vector<1x128xf32>
    %326 = arith.addf %309, %325 : vector<1x128xf32>
    %c73 = arith.constant 73 : index
    %327 = memref.load %arg1[%c73] : memref<144xf32, #tpu.memory_space<smem>>
    %328 = vector.broadcast %327 : f32 to vector<1x128xf32>
    %329 = arith.mulf %328, %322 : vector<1x128xf32>
    %330 = arith.addf %313, %329 : vector<1x128xf32>
    %c74 = arith.constant 74 : index
    %331 = memref.load %arg1[%c74] : memref<144xf32, #tpu.memory_space<smem>>
    %332 = vector.broadcast %331 : f32 to vector<1x128xf32>
    %333 = arith.mulf %332, %322 : vector<1x128xf32>
    %334 = arith.addf %317, %333 : vector<1x128xf32>
    %c75 = arith.constant 75 : index
    %335 = memref.load %arg1[%c75] : memref<144xf32, #tpu.memory_space<smem>>
    %336 = vector.broadcast %335 : f32 to vector<1x128xf32>
    %337 = arith.mulf %336, %322 : vector<1x128xf32>
    %338 = arith.addf %321, %337 : vector<1x128xf32>
    %c19_45 = arith.constant 19 : index
    %c0_46 = arith.constant 0 : index
    %339 = vector.load %arg0[%c19_45, %c0_46] : memref<36x128xf32, #tpu.memory_space<vmem>>, vector<1x128xf32>
    %c76 = arith.constant 76 : index
    %340 = memref.load %arg1[%c76] : memref<144xf32, #tpu.memory_space<smem>>
    %341 = vector.broadcast %340 : f32 to vector<1x128xf32>
    %342 = arith.mulf %341, %339 : vector<1x128xf32>
    %343 = arith.addf %326, %342 : vector<1x128xf32>
    %c77 = arith.constant 77 : index
    %344 = memref.load %arg1[%c77] : memref<144xf32, #tpu.memory_space<smem>>
    %345 = vector.broadcast %344 : f32 to vector<1x128xf32>
    %346 = arith.mulf %345, %339 : vector<1x128xf32>
    %347 = arith.addf %330, %346 : vector<1x128xf32>
    %c78 = arith.constant 78 : index
    %348 = memref.load %arg1[%c78] : memref<144xf32, #tpu.memory_space<smem>>
    %349 = vector.broadcast %348 : f32 to vector<1x128xf32>
    %350 = arith.mulf %349, %339 : vector<1x128xf32>
    %351 = arith.addf %334, %350 : vector<1x128xf32>
    %c79 = arith.constant 79 : index
    %352 = memref.load %arg1[%c79] : memref<144xf32, #tpu.memory_space<smem>>
    %353 = vector.broadcast %352 : f32 to vector<1x128xf32>
    %354 = arith.mulf %353, %339 : vector<1x128xf32>
    %355 = arith.addf %338, %354 : vector<1x128xf32>
    %c20_47 = arith.constant 20 : index
    %c0_48 = arith.constant 0 : index
    %356 = vector.load %arg0[%c20_47, %c0_48] : memref<36x128xf32, #tpu.memory_space<vmem>>, vector<1x128xf32>
    %c80 = arith.constant 80 : index
    %357 = memref.load %arg1[%c80] : memref<144xf32, #tpu.memory_space<smem>>
    %358 = vector.broadcast %357 : f32 to vector<1x128xf32>
    %359 = arith.mulf %358, %356 : vector<1x128xf32>
    %360 = arith.addf %343, %359 : vector<1x128xf32>
    %c81 = arith.constant 81 : index
    %361 = memref.load %arg1[%c81] : memref<144xf32, #tpu.memory_space<smem>>
    %362 = vector.broadcast %361 : f32 to vector<1x128xf32>
    %363 = arith.mulf %362, %356 : vector<1x128xf32>
    %364 = arith.addf %347, %363 : vector<1x128xf32>
    %c82 = arith.constant 82 : index
    %365 = memref.load %arg1[%c82] : memref<144xf32, #tpu.memory_space<smem>>
    %366 = vector.broadcast %365 : f32 to vector<1x128xf32>
    %367 = arith.mulf %366, %356 : vector<1x128xf32>
    %368 = arith.addf %351, %367 : vector<1x128xf32>
    %c83 = arith.constant 83 : index
    %369 = memref.load %arg1[%c83] : memref<144xf32, #tpu.memory_space<smem>>
    %370 = vector.broadcast %369 : f32 to vector<1x128xf32>
    %371 = arith.mulf %370, %356 : vector<1x128xf32>
    %372 = arith.addf %355, %371 : vector<1x128xf32>
    %c21_49 = arith.constant 21 : index
    %c0_50 = arith.constant 0 : index
    %373 = vector.load %arg0[%c21_49, %c0_50] : memref<36x128xf32, #tpu.memory_space<vmem>>, vector<1x128xf32>
    %c84 = arith.constant 84 : index
    %374 = memref.load %arg1[%c84] : memref<144xf32, #tpu.memory_space<smem>>
    %375 = vector.broadcast %374 : f32 to vector<1x128xf32>
    %376 = arith.mulf %375, %373 : vector<1x128xf32>
    %377 = arith.addf %360, %376 : vector<1x128xf32>
    %c85 = arith.constant 85 : index
    %378 = memref.load %arg1[%c85] : memref<144xf32, #tpu.memory_space<smem>>
    %379 = vector.broadcast %378 : f32 to vector<1x128xf32>
    %380 = arith.mulf %379, %373 : vector<1x128xf32>
    %381 = arith.addf %364, %380 : vector<1x128xf32>
    %c86 = arith.constant 86 : index
    %382 = memref.load %arg1[%c86] : memref<144xf32, #tpu.memory_space<smem>>
    %383 = vector.broadcast %382 : f32 to vector<1x128xf32>
    %384 = arith.mulf %383, %373 : vector<1x128xf32>
    %385 = arith.addf %368, %384 : vector<1x128xf32>
    %c87 = arith.constant 87 : index
    %386 = memref.load %arg1[%c87] : memref<144xf32, #tpu.memory_space<smem>>
    %387 = vector.broadcast %386 : f32 to vector<1x128xf32>
    %388 = arith.mulf %387, %373 : vector<1x128xf32>
    %389 = arith.addf %372, %388 : vector<1x128xf32>
    %c22_51 = arith.constant 22 : index
    %c0_52 = arith.constant 0 : index
    %390 = vector.load %arg0[%c22_51, %c0_52] : memref<36x128xf32, #tpu.memory_space<vmem>>, vector<1x128xf32>
    %c88 = arith.constant 88 : index
    %391 = memref.load %arg1[%c88] : memref<144xf32, #tpu.memory_space<smem>>
    %392 = vector.broadcast %391 : f32 to vector<1x128xf32>
    %393 = arith.mulf %392, %390 : vector<1x128xf32>
    %394 = arith.addf %377, %393 : vector<1x128xf32>
    %c89 = arith.constant 89 : index
    %395 = memref.load %arg1[%c89] : memref<144xf32, #tpu.memory_space<smem>>
    %396 = vector.broadcast %395 : f32 to vector<1x128xf32>
    %397 = arith.mulf %396, %390 : vector<1x128xf32>
    %398 = arith.addf %381, %397 : vector<1x128xf32>
    %c90 = arith.constant 90 : index
    %399 = memref.load %arg1[%c90] : memref<144xf32, #tpu.memory_space<smem>>
    %400 = vector.broadcast %399 : f32 to vector<1x128xf32>
    %401 = arith.mulf %400, %390 : vector<1x128xf32>
    %402 = arith.addf %385, %401 : vector<1x128xf32>
    %c91 = arith.constant 91 : index
    %403 = memref.load %arg1[%c91] : memref<144xf32, #tpu.memory_space<smem>>
    %404 = vector.broadcast %403 : f32 to vector<1x128xf32>
    %405 = arith.mulf %404, %390 : vector<1x128xf32>
    %406 = arith.addf %389, %405 : vector<1x128xf32>
    %c23_53 = arith.constant 23 : index
    %c0_54 = arith.constant 0 : index
    %407 = vector.load %arg0[%c23_53, %c0_54] : memref<36x128xf32, #tpu.memory_space<vmem>>, vector<1x128xf32>
    %c92 = arith.constant 92 : index
    %408 = memref.load %arg1[%c92] : memref<144xf32, #tpu.memory_space<smem>>
    %409 = vector.broadcast %408 : f32 to vector<1x128xf32>
    %410 = arith.mulf %409, %407 : vector<1x128xf32>
    %411 = arith.addf %394, %410 : vector<1x128xf32>
    %c93 = arith.constant 93 : index
    %412 = memref.load %arg1[%c93] : memref<144xf32, #tpu.memory_space<smem>>
    %413 = vector.broadcast %412 : f32 to vector<1x128xf32>
    %414 = arith.mulf %413, %407 : vector<1x128xf32>
    %415 = arith.addf %398, %414 : vector<1x128xf32>
    %c94 = arith.constant 94 : index
    %416 = memref.load %arg1[%c94] : memref<144xf32, #tpu.memory_space<smem>>
    %417 = vector.broadcast %416 : f32 to vector<1x128xf32>
    %418 = arith.mulf %417, %407 : vector<1x128xf32>
    %419 = arith.addf %402, %418 : vector<1x128xf32>
    %c95 = arith.constant 95 : index
    %420 = memref.load %arg1[%c95] : memref<144xf32, #tpu.memory_space<smem>>
    %421 = vector.broadcast %420 : f32 to vector<1x128xf32>
    %422 = arith.mulf %421, %407 : vector<1x128xf32>
    %423 = arith.addf %406, %422 : vector<1x128xf32>
    %c24_55 = arith.constant 24 : index
    %c0_56 = arith.constant 0 : index
    %424 = vector.load %arg0[%c24_55, %c0_56] : memref<36x128xf32, #tpu.memory_space<vmem>>, vector<1x128xf32>
    %c96 = arith.constant 96 : index
    %425 = memref.load %arg1[%c96] : memref<144xf32, #tpu.memory_space<smem>>
    %426 = vector.broadcast %425 : f32 to vector<1x128xf32>
    %427 = arith.mulf %426, %424 : vector<1x128xf32>
    %428 = arith.addf %411, %427 : vector<1x128xf32>
    %c97 = arith.constant 97 : index
    %429 = memref.load %arg1[%c97] : memref<144xf32, #tpu.memory_space<smem>>
    %430 = vector.broadcast %429 : f32 to vector<1x128xf32>
    %431 = arith.mulf %430, %424 : vector<1x128xf32>
    %432 = arith.addf %415, %431 : vector<1x128xf32>
    %c98 = arith.constant 98 : index
    %433 = memref.load %arg1[%c98] : memref<144xf32, #tpu.memory_space<smem>>
    %434 = vector.broadcast %433 : f32 to vector<1x128xf32>
    %435 = arith.mulf %434, %424 : vector<1x128xf32>
    %436 = arith.addf %419, %435 : vector<1x128xf32>
    %c99 = arith.constant 99 : index
    %437 = memref.load %arg1[%c99] : memref<144xf32, #tpu.memory_space<smem>>
    %438 = vector.broadcast %437 : f32 to vector<1x128xf32>
    %439 = arith.mulf %438, %424 : vector<1x128xf32>
    %440 = arith.addf %423, %439 : vector<1x128xf32>
    %c25_57 = arith.constant 25 : index
    %c0_58 = arith.constant 0 : index
    %441 = vector.load %arg0[%c25_57, %c0_58] : memref<36x128xf32, #tpu.memory_space<vmem>>, vector<1x128xf32>
    %c100 = arith.constant 100 : index
    %442 = memref.load %arg1[%c100] : memref<144xf32, #tpu.memory_space<smem>>
    %443 = vector.broadcast %442 : f32 to vector<1x128xf32>
    %444 = arith.mulf %443, %441 : vector<1x128xf32>
    %445 = arith.addf %428, %444 : vector<1x128xf32>
    %c101 = arith.constant 101 : index
    %446 = memref.load %arg1[%c101] : memref<144xf32, #tpu.memory_space<smem>>
    %447 = vector.broadcast %446 : f32 to vector<1x128xf32>
    %448 = arith.mulf %447, %441 : vector<1x128xf32>
    %449 = arith.addf %432, %448 : vector<1x128xf32>
    %c102 = arith.constant 102 : index
    %450 = memref.load %arg1[%c102] : memref<144xf32, #tpu.memory_space<smem>>
    %451 = vector.broadcast %450 : f32 to vector<1x128xf32>
    %452 = arith.mulf %451, %441 : vector<1x128xf32>
    %453 = arith.addf %436, %452 : vector<1x128xf32>
    %c103 = arith.constant 103 : index
    %454 = memref.load %arg1[%c103] : memref<144xf32, #tpu.memory_space<smem>>
    %455 = vector.broadcast %454 : f32 to vector<1x128xf32>
    %456 = arith.mulf %455, %441 : vector<1x128xf32>
    %457 = arith.addf %440, %456 : vector<1x128xf32>
    %c26_59 = arith.constant 26 : index
    %c0_60 = arith.constant 0 : index
    %458 = vector.load %arg0[%c26_59, %c0_60] : memref<36x128xf32, #tpu.memory_space<vmem>>, vector<1x128xf32>
    %c104 = arith.constant 104 : index
    %459 = memref.load %arg1[%c104] : memref<144xf32, #tpu.memory_space<smem>>
    %460 = vector.broadcast %459 : f32 to vector<1x128xf32>
    %461 = arith.mulf %460, %458 : vector<1x128xf32>
    %462 = arith.addf %445, %461 : vector<1x128xf32>
    %c105 = arith.constant 105 : index
    %463 = memref.load %arg1[%c105] : memref<144xf32, #tpu.memory_space<smem>>
    %464 = vector.broadcast %463 : f32 to vector<1x128xf32>
    %465 = arith.mulf %464, %458 : vector<1x128xf32>
    %466 = arith.addf %449, %465 : vector<1x128xf32>
    %c106 = arith.constant 106 : index
    %467 = memref.load %arg1[%c106] : memref<144xf32, #tpu.memory_space<smem>>
    %468 = vector.broadcast %467 : f32 to vector<1x128xf32>
    %469 = arith.mulf %468, %458 : vector<1x128xf32>
    %470 = arith.addf %453, %469 : vector<1x128xf32>
    %c107 = arith.constant 107 : index
    %471 = memref.load %arg1[%c107] : memref<144xf32, #tpu.memory_space<smem>>
    %472 = vector.broadcast %471 : f32 to vector<1x128xf32>
    %473 = arith.mulf %472, %458 : vector<1x128xf32>
    %474 = arith.addf %457, %473 : vector<1x128xf32>
    %c27_61 = arith.constant 27 : index
    %c0_62 = arith.constant 0 : index
    %475 = vector.load %arg0[%c27_61, %c0_62] : memref<36x128xf32, #tpu.memory_space<vmem>>, vector<1x128xf32>
    %c108 = arith.constant 108 : index
    %476 = memref.load %arg1[%c108] : memref<144xf32, #tpu.memory_space<smem>>
    %477 = vector.broadcast %476 : f32 to vector<1x128xf32>
    %478 = arith.mulf %477, %475 : vector<1x128xf32>
    %479 = arith.addf %462, %478 : vector<1x128xf32>
    %c109 = arith.constant 109 : index
    %480 = memref.load %arg1[%c109] : memref<144xf32, #tpu.memory_space<smem>>
    %481 = vector.broadcast %480 : f32 to vector<1x128xf32>
    %482 = arith.mulf %481, %475 : vector<1x128xf32>
    %483 = arith.addf %466, %482 : vector<1x128xf32>
    %c110 = arith.constant 110 : index
    %484 = memref.load %arg1[%c110] : memref<144xf32, #tpu.memory_space<smem>>
    %485 = vector.broadcast %484 : f32 to vector<1x128xf32>
    %486 = arith.mulf %485, %475 : vector<1x128xf32>
    %487 = arith.addf %470, %486 : vector<1x128xf32>
    %c111 = arith.constant 111 : index
    %488 = memref.load %arg1[%c111] : memref<144xf32, #tpu.memory_space<smem>>
    %489 = vector.broadcast %488 : f32 to vector<1x128xf32>
    %490 = arith.mulf %489, %475 : vector<1x128xf32>
    %491 = arith.addf %474, %490 : vector<1x128xf32>
    %c28_63 = arith.constant 28 : index
    %c0_64 = arith.constant 0 : index
    %492 = vector.load %arg0[%c28_63, %c0_64] : memref<36x128xf32, #tpu.memory_space<vmem>>, vector<1x128xf32>
    %c112 = arith.constant 112 : index
    %493 = memref.load %arg1[%c112] : memref<144xf32, #tpu.memory_space<smem>>
    %494 = vector.broadcast %493 : f32 to vector<1x128xf32>
    %495 = arith.mulf %494, %492 : vector<1x128xf32>
    %496 = arith.addf %479, %495 : vector<1x128xf32>
    %c113 = arith.constant 113 : index
    %497 = memref.load %arg1[%c113] : memref<144xf32, #tpu.memory_space<smem>>
    %498 = vector.broadcast %497 : f32 to vector<1x128xf32>
    %499 = arith.mulf %498, %492 : vector<1x128xf32>
    %500 = arith.addf %483, %499 : vector<1x128xf32>
    %c114 = arith.constant 114 : index
    %501 = memref.load %arg1[%c114] : memref<144xf32, #tpu.memory_space<smem>>
    %502 = vector.broadcast %501 : f32 to vector<1x128xf32>
    %503 = arith.mulf %502, %492 : vector<1x128xf32>
    %504 = arith.addf %487, %503 : vector<1x128xf32>
    %c115 = arith.constant 115 : index
    %505 = memref.load %arg1[%c115] : memref<144xf32, #tpu.memory_space<smem>>
    %506 = vector.broadcast %505 : f32 to vector<1x128xf32>
    %507 = arith.mulf %506, %492 : vector<1x128xf32>
    %508 = arith.addf %491, %507 : vector<1x128xf32>
    %c29_65 = arith.constant 29 : index
    %c0_66 = arith.constant 0 : index
    %509 = vector.load %arg0[%c29_65, %c0_66] : memref<36x128xf32, #tpu.memory_space<vmem>>, vector<1x128xf32>
    %c116 = arith.constant 116 : index
    %510 = memref.load %arg1[%c116] : memref<144xf32, #tpu.memory_space<smem>>
    %511 = vector.broadcast %510 : f32 to vector<1x128xf32>
    %512 = arith.mulf %511, %509 : vector<1x128xf32>
    %513 = arith.addf %496, %512 : vector<1x128xf32>
    %c117 = arith.constant 117 : index
    %514 = memref.load %arg1[%c117] : memref<144xf32, #tpu.memory_space<smem>>
    %515 = vector.broadcast %514 : f32 to vector<1x128xf32>
    %516 = arith.mulf %515, %509 : vector<1x128xf32>
    %517 = arith.addf %500, %516 : vector<1x128xf32>
    %c118 = arith.constant 118 : index
    %518 = memref.load %arg1[%c118] : memref<144xf32, #tpu.memory_space<smem>>
    %519 = vector.broadcast %518 : f32 to vector<1x128xf32>
    %520 = arith.mulf %519, %509 : vector<1x128xf32>
    %521 = arith.addf %504, %520 : vector<1x128xf32>
    %c119 = arith.constant 119 : index
    %522 = memref.load %arg1[%c119] : memref<144xf32, #tpu.memory_space<smem>>
    %523 = vector.broadcast %522 : f32 to vector<1x128xf32>
    %524 = arith.mulf %523, %509 : vector<1x128xf32>
    %525 = arith.addf %508, %524 : vector<1x128xf32>
    %c30_67 = arith.constant 30 : index
    %c0_68 = arith.constant 0 : index
    %526 = vector.load %arg0[%c30_67, %c0_68] : memref<36x128xf32, #tpu.memory_space<vmem>>, vector<1x128xf32>
    %c120 = arith.constant 120 : index
    %527 = memref.load %arg1[%c120] : memref<144xf32, #tpu.memory_space<smem>>
    %528 = vector.broadcast %527 : f32 to vector<1x128xf32>
    %529 = arith.mulf %528, %526 : vector<1x128xf32>
    %530 = arith.addf %513, %529 : vector<1x128xf32>
    %c121 = arith.constant 121 : index
    %531 = memref.load %arg1[%c121] : memref<144xf32, #tpu.memory_space<smem>>
    %532 = vector.broadcast %531 : f32 to vector<1x128xf32>
    %533 = arith.mulf %532, %526 : vector<1x128xf32>
    %534 = arith.addf %517, %533 : vector<1x128xf32>
    %c122 = arith.constant 122 : index
    %535 = memref.load %arg1[%c122] : memref<144xf32, #tpu.memory_space<smem>>
    %536 = vector.broadcast %535 : f32 to vector<1x128xf32>
    %537 = arith.mulf %536, %526 : vector<1x128xf32>
    %538 = arith.addf %521, %537 : vector<1x128xf32>
    %c123 = arith.constant 123 : index
    %539 = memref.load %arg1[%c123] : memref<144xf32, #tpu.memory_space<smem>>
    %540 = vector.broadcast %539 : f32 to vector<1x128xf32>
    %541 = arith.mulf %540, %526 : vector<1x128xf32>
    %542 = arith.addf %525, %541 : vector<1x128xf32>
    %c31_69 = arith.constant 31 : index
    %c0_70 = arith.constant 0 : index
    %543 = vector.load %arg0[%c31_69, %c0_70] : memref<36x128xf32, #tpu.memory_space<vmem>>, vector<1x128xf32>
    %c124 = arith.constant 124 : index
    %544 = memref.load %arg1[%c124] : memref<144xf32, #tpu.memory_space<smem>>
    %545 = vector.broadcast %544 : f32 to vector<1x128xf32>
    %546 = arith.mulf %545, %543 : vector<1x128xf32>
    %547 = arith.addf %530, %546 : vector<1x128xf32>
    %c125 = arith.constant 125 : index
    %548 = memref.load %arg1[%c125] : memref<144xf32, #tpu.memory_space<smem>>
    %549 = vector.broadcast %548 : f32 to vector<1x128xf32>
    %550 = arith.mulf %549, %543 : vector<1x128xf32>
    %551 = arith.addf %534, %550 : vector<1x128xf32>
    %c126 = arith.constant 126 : index
    %552 = memref.load %arg1[%c126] : memref<144xf32, #tpu.memory_space<smem>>
    %553 = vector.broadcast %552 : f32 to vector<1x128xf32>
    %554 = arith.mulf %553, %543 : vector<1x128xf32>
    %555 = arith.addf %538, %554 : vector<1x128xf32>
    %c127 = arith.constant 127 : index
    %556 = memref.load %arg1[%c127] : memref<144xf32, #tpu.memory_space<smem>>
    %557 = vector.broadcast %556 : f32 to vector<1x128xf32>
    %558 = arith.mulf %557, %543 : vector<1x128xf32>
    %559 = arith.addf %542, %558 : vector<1x128xf32>
    %c32_71 = arith.constant 32 : index
    %c0_72 = arith.constant 0 : index
    %560 = vector.load %arg0[%c32_71, %c0_72] : memref<36x128xf32, #tpu.memory_space<vmem>>, vector<1x128xf32>
    %c128 = arith.constant 128 : index
    %561 = memref.load %arg1[%c128] : memref<144xf32, #tpu.memory_space<smem>>
    %562 = vector.broadcast %561 : f32 to vector<1x128xf32>
    %563 = arith.mulf %562, %560 : vector<1x128xf32>
    %564 = arith.addf %547, %563 : vector<1x128xf32>
    %c129 = arith.constant 129 : index
    %565 = memref.load %arg1[%c129] : memref<144xf32, #tpu.memory_space<smem>>
    %566 = vector.broadcast %565 : f32 to vector<1x128xf32>
    %567 = arith.mulf %566, %560 : vector<1x128xf32>
    %568 = arith.addf %551, %567 : vector<1x128xf32>
    %c130 = arith.constant 130 : index
    %569 = memref.load %arg1[%c130] : memref<144xf32, #tpu.memory_space<smem>>
    %570 = vector.broadcast %569 : f32 to vector<1x128xf32>
    %571 = arith.mulf %570, %560 : vector<1x128xf32>
    %572 = arith.addf %555, %571 : vector<1x128xf32>
    %c131 = arith.constant 131 : index
    %573 = memref.load %arg1[%c131] : memref<144xf32, #tpu.memory_space<smem>>
    %574 = vector.broadcast %573 : f32 to vector<1x128xf32>
    %575 = arith.mulf %574, %560 : vector<1x128xf32>
    %576 = arith.addf %559, %575 : vector<1x128xf32>
    %c33_73 = arith.constant 33 : index
    %c0_74 = arith.constant 0 : index
    %577 = vector.load %arg0[%c33_73, %c0_74] : memref<36x128xf32, #tpu.memory_space<vmem>>, vector<1x128xf32>
    %c132 = arith.constant 132 : index
    %578 = memref.load %arg1[%c132] : memref<144xf32, #tpu.memory_space<smem>>
    %579 = vector.broadcast %578 : f32 to vector<1x128xf32>
    %580 = arith.mulf %579, %577 : vector<1x128xf32>
    %581 = arith.addf %564, %580 : vector<1x128xf32>
    %c133 = arith.constant 133 : index
    %582 = memref.load %arg1[%c133] : memref<144xf32, #tpu.memory_space<smem>>
    %583 = vector.broadcast %582 : f32 to vector<1x128xf32>
    %584 = arith.mulf %583, %577 : vector<1x128xf32>
    %585 = arith.addf %568, %584 : vector<1x128xf32>
    %c134 = arith.constant 134 : index
    %586 = memref.load %arg1[%c134] : memref<144xf32, #tpu.memory_space<smem>>
    %587 = vector.broadcast %586 : f32 to vector<1x128xf32>
    %588 = arith.mulf %587, %577 : vector<1x128xf32>
    %589 = arith.addf %572, %588 : vector<1x128xf32>
    %c135 = arith.constant 135 : index
    %590 = memref.load %arg1[%c135] : memref<144xf32, #tpu.memory_space<smem>>
    %591 = vector.broadcast %590 : f32 to vector<1x128xf32>
    %592 = arith.mulf %591, %577 : vector<1x128xf32>
    %593 = arith.addf %576, %592 : vector<1x128xf32>
    %c34_75 = arith.constant 34 : index
    %c0_76 = arith.constant 0 : index
    %594 = vector.load %arg0[%c34_75, %c0_76] : memref<36x128xf32, #tpu.memory_space<vmem>>, vector<1x128xf32>
    %c136 = arith.constant 136 : index
    %595 = memref.load %arg1[%c136] : memref<144xf32, #tpu.memory_space<smem>>
    %596 = vector.broadcast %595 : f32 to vector<1x128xf32>
    %597 = arith.mulf %596, %594 : vector<1x128xf32>
    %598 = arith.addf %581, %597 : vector<1x128xf32>
    %c137 = arith.constant 137 : index
    %599 = memref.load %arg1[%c137] : memref<144xf32, #tpu.memory_space<smem>>
    %600 = vector.broadcast %599 : f32 to vector<1x128xf32>
    %601 = arith.mulf %600, %594 : vector<1x128xf32>
    %602 = arith.addf %585, %601 : vector<1x128xf32>
    %c138 = arith.constant 138 : index
    %603 = memref.load %arg1[%c138] : memref<144xf32, #tpu.memory_space<smem>>
    %604 = vector.broadcast %603 : f32 to vector<1x128xf32>
    %605 = arith.mulf %604, %594 : vector<1x128xf32>
    %606 = arith.addf %589, %605 : vector<1x128xf32>
    %c139 = arith.constant 139 : index
    %607 = memref.load %arg1[%c139] : memref<144xf32, #tpu.memory_space<smem>>
    %608 = vector.broadcast %607 : f32 to vector<1x128xf32>
    %609 = arith.mulf %608, %594 : vector<1x128xf32>
    %610 = arith.addf %593, %609 : vector<1x128xf32>
    %c35_77 = arith.constant 35 : index
    %c0_78 = arith.constant 0 : index
    %611 = vector.load %arg0[%c35_77, %c0_78] : memref<36x128xf32, #tpu.memory_space<vmem>>, vector<1x128xf32>
    %c140 = arith.constant 140 : index
    %612 = memref.load %arg1[%c140] : memref<144xf32, #tpu.memory_space<smem>>
    %613 = vector.broadcast %612 : f32 to vector<1x128xf32>
    %614 = arith.mulf %613, %611 : vector<1x128xf32>
    %615 = arith.addf %598, %614 : vector<1x128xf32>
    %c141 = arith.constant 141 : index
    %616 = memref.load %arg1[%c141] : memref<144xf32, #tpu.memory_space<smem>>
    %617 = vector.broadcast %616 : f32 to vector<1x128xf32>
    %618 = arith.mulf %617, %611 : vector<1x128xf32>
    %619 = arith.addf %602, %618 : vector<1x128xf32>
    %c142 = arith.constant 142 : index
    %620 = memref.load %arg1[%c142] : memref<144xf32, #tpu.memory_space<smem>>
    %621 = vector.broadcast %620 : f32 to vector<1x128xf32>
    %622 = arith.mulf %621, %611 : vector<1x128xf32>
    %623 = arith.addf %606, %622 : vector<1x128xf32>
    %c143 = arith.constant 143 : index
    %624 = memref.load %arg1[%c143] : memref<144xf32, #tpu.memory_space<smem>>
    %625 = vector.broadcast %624 : f32 to vector<1x128xf32>
    %626 = arith.mulf %625, %611 : vector<1x128xf32>
    %627 = arith.addf %610, %626 : vector<1x128xf32>
    %628 = tpu.concatenate %615, %619, %623, %627 in 0 : vector<1x128xf32>, vector<1x128xf32>, vector<1x128xf32>, vector<1x128xf32> -> vector<4x128xf32>
    %cst_79 = arith.constant 0.00999999977 : f32
    %629 = vector.broadcast %cst_79 : f32 to vector<4x128xf32>
    %630 = arith.mulf %629, %628 : vector<4x128xf32>
    %631 = arith.maximumf %628, %630 : vector<4x128xf32>
    %c0_80 = arith.constant 0 : index
    %c0_81 = arith.constant 0 : index
    %632 = vector.load %arg3[%c0_80, %c0_81] : memref<4x128xf32, #tpu.memory_space<vmem>>, vector<4x128xf32>
    tpu.vector_store %arg3[%c0_80, %c0_81], %631 {strides = array<i32>} : memref<4x128xf32, #tpu.memory_space<vmem>>, vector<4x128xf32>,
    return
  }
}

</mosaic_0001>

<bundles_post_ra>
// kernel: tpu_custom_call.1
= control target key start
LH: loop header
LB: loop body
LE: loop exit
PB: predicated region body
PF: predicated region fallthrough
CT: control target
= control target key end

     0   :  { %8 = vsyncpa [#allocation3], 0  ;;  %s990_s0 = inlined_call_operand.hbm [shape: f32[36,128], index: 0, kind: input, shape index: {}]   ;;  %s991_s1 = inlined_call_operand.hbm [shape: f32[144], index: 1, kind: input, shape index: {}]   ;;  %s992_s2 = inlined_call_operand.vmem [shape: f32[4], index: 2, kind: input, shape index: {}]   ;;  %s993_s3 = inlined_call_operand.hbm [shape: f32[4,128], index: 3, kind: output, shape index: {}]  }
   0x1   :  { %9 = vsyncpa [#allocation5], 0 }
   0x2   :  { %10 = vsyncpa [#allocation6], 0 }
   0x3   :  { %11 = vsyncpa [#allocation4], 0  ;;  %s16_s14 = sshll.u32 %s990_s0, 4  ;;  %s949_s15 = smov [#allocation2]   ;;  %s17_s14 = int_to_ptr.hbm [resolvable:$true] %s16_s14 }
   0x4   :  { %s18_s16 = sshll.u32 %s949_s15, 4  ;;  %s30_s19 = sshll.u32 %s991_s1, 4  ;;  %s19_s16 = int_to_ptr.vmem [resolvable:$true] %s18_s16  ;;  %s31_s19 = int_to_ptr.hbm [resolvable:$true] %s30_s19 }
   0x5   :  { %s950_s20 = smov 128   ;;  %s951_s21 = smov 8  }
   0x6   :  { %24 = dma.hbm_to_vmem [thread:$0]  %s17_s14, 640, %s19_s16, [#allocation3], %s950_s20, %s950_s20, %s951_s21  }
   0x7   :  { %s952_s22 = smov [#allocation7]   ;;  %s39_s25 = sshll.u32 %s992_s2, 4  ;;  %s40_s25 = int_to_ptr.vmem [resolvable:$true] %s39_s25 }
   0x8   :  { %33 = dma.hbm_to_smem %s31_s19, 32, %s952_s22, [#allocation5]  }
   0x9   :  { %s953_s0 = smov [#allocation8]  }
   0xa   :  { %42 = dma.vmem_to_smem %s40_s25, 16, %s953_s0, [#allocation6]  }
   0xb   :  { %941 = dma.done.wait [#allocation3], 640  }
   0xc   :  { %942 = vsyncadd [#allocation3], 4294966656 }
   0xd   :  { %943 = dma.done.wait [#allocation5], 32  }
   0xe   :  { %944 = vsyncadd [#allocation5], 4294967264 }
   0xf   :  { %945 = dma.done.wait [#allocation6], 16  }
  0x10   :  { %946 = vsyncadd [#allocation6], 4294967280 }
  0x11   :  { %55 = sfence }
  0x12   :  { %s56_s1 = sld [smem:[#allocation8]]  ;;  %v68_v0 = vld [vmem:[#allocation2] sm:$0x1]  ;;  %v85_v12 = vld [vmem:[#allocation2 + $0x1] sm:$0x1]  ;;  %vm689_vm0 = vcmask 1040384  }
  0x13   :  { %s717_s26 = sld [smem:[#allocation8 + $0x1]]  ;;  %v102_v25 = vld [vmem:[#allocation2 + $0x2] sm:$0x1]  ;;  %v119_v38 = vld [vmem:[#allocation2 + $0x3] sm:$0x1]  ;;  %vm691_vm1 = vcmask 1041408  }
  0x14   :  { %s718_s27 = sld [smem:[#allocation8 + $0x2]]  ;;  %v136_v51 = vld [vmem:[#allocation2 + $0x4] sm:$0x1]  ;;  %vm693_vm2 = vcmask 1042432  }
  0x15   :  { %s984_s28 = sld [smem:[#allocation8 + $0x3]] }
  0x16   :  { %s69_s29 = sld [smem:[#allocation7]] }
  0x17   :  { %s720_s30 = sld [smem:[#allocation7 + $0x1]] }
  0x18   :  { %s721_s4 = sld [smem:[#allocation7 + $0x2]]  ;;  %v57_v2 = vstv %s56_s1 }
  0x19   :  { %s722_s2 = sld [smem:[#allocation7 + $0x3]]  ;;  %v60_v3 = vstv %s717_s26 }
  0x1a   :  { %s723_s5 = sld [smem:[#allocation7 + $0x4]]  ;;  %v63_v6 = vstv %s718_s27 }
  0x1b   :  { %s724_s6 = sld [smem:[#allocation7 + $0x5]]  ;;  %v66_v9 = vstv %s984_s28 }
  0x1c   :  { %v70_v1 = vstv %s69_s29  ;;  %s725_s7 = sld [smem:[#allocation7 + $0x6]] }
  0x1d   :  { %v71_v4 = vmul.f32 %v70_v1, %v68_v0  ;;  %v74_v5 = vstv %s720_s30  ;;  %s726_s8 = sld [smem:[#allocation7 + $0x7]] }
  0x1e   :  { %v75_v7 = vmul.f32 %v74_v5, %v68_v0  ;;  %v78_v8 = vstv %s721_s4  ;;  %s727_s9 = sld [smem:[#allocation7 + $0x8]] }
  0x1f   :  { %v79_v10 = vmul.f32 %v78_v8, %v68_v0  ;;  %v82_v11 = vstv %s722_s2  ;;  %s728_s10 = sld [smem:[#allocation7 + $0x9]]  ;;  %v72_v13 = vadd.f32 %v71_v4, %v57_v2 }
  0x20   :  { %v76_v14 = vadd.f32 %v75_v7, %v60_v3  ;;  %v83_v15 = vmul.f32 %v82_v11, %v68_v0  ;;  %v87_v16 = vstv %s723_s5  ;;  %s729_s11 = sld [smem:[#allocation7 + $0xa]]  ;;  %v153_v0 = vld [vmem:[#allocation2 + $0x5] sm:$0x1] }
  0x21   :  { %v80_v17 = vadd.f32 %v79_v10, %v63_v6  ;;  %v88_v18 = vmul.f32 %v87_v16, %v85_v12  ;;  %v91_v19 = vstv %s724_s6  ;;  %s730_s12 = sld [smem:[#allocation7 + $0xb]] }
  0x22   :  { %v84_v20 = vadd.f32 %v83_v15, %v66_v9  ;;  %v92_v21 = vmul.f32 %v91_v19, %v85_v12  ;;  %v95_v22 = vstv %s725_s7  ;;  %s731_s13 = sld [smem:[#allocation7 + $0xc]] }
  0x23   :  { %v96_v23 = vmul.f32 %v95_v22, %v85_v12  ;;  %v99_v24 = vstv %s726_s8  ;;  %s732_s14 = sld [smem:[#allocation7 + $0xd]]  ;;  %v89_v26 = vadd.f32 %v88_v18, %v72_v13  ;;  %v170_v13 = vld [vmem:[#allocation2 + $0x6] sm:$0x1] }
  0x24   :  { %v93_v27 = vadd.f32 %v92_v21, %v76_v14  ;;  %v100_v28 = vmul.f32 %v99_v24, %v85_v12  ;;  %v104_v29 = vstv %s727_s9  ;;  %s733_s15 = sld [smem:[#allocation7 + $0xe]] }
  0x25   :  { %v97_v30 = vadd.f32 %v96_v23, %v80_v17  ;;  %v105_v31 = vmul.f32 %v104_v29, %v102_v25  ;;  %v108_v32 = vstv %s728_s10  ;;  %s734_s16 = sld [smem:[#allocation7 + $0xf]] }
  0x26   :  { %v101_v33 = vadd.f32 %v100_v28, %v84_v20  ;;  %v109_v34 = vmul.f32 %v108_v32, %v102_v25  ;;  %v112_v35 = vstv %s729_s11  ;;  %s735_s17 = sld [smem:[#allocation7 + $0x10]] }
  0x27   :  { %v113_v36 = vmul.f32 %v112_v35, %v102_v25  ;;  %v116_v37 = vstv %s730_s12  ;;  %s736_s18 = sld [smem:[#allocation7 + $0x11]]  ;;  %v106_v39 = vadd.f32 %v105_v31, %v89_v26  ;;  %v187_v26 = vld [vmem:[#allocation2 + $0x7] sm:$0x1] }
  0x28   :  { %v110_v40 = vadd.f32 %v109_v34, %v93_v27  ;;  %v117_v41 = vmul.f32 %v116_v37, %v102_v25  ;;  %v121_v42 = vstv %s731_s13  ;;  %s737_s19 = sld [smem:[#allocation7 + $0x12]] }
  0x29   :  { %v114_v43 = vadd.f32 %v113_v36, %v97_v30  ;;  %v122_v44 = vmul.f32 %v121_v42, %v119_v38  ;;  %v125_v45 = vstv %s732_s14  ;;  %s738_s20 = sld [smem:[#allocation7 + $0x13]] }
  0x2a   :  { %v118_v46 = vadd.f32 %v117_v41, %v101_v33  ;;  %v126_v47 = vmul.f32 %v125_v45, %v119_v38  ;;  %v129_v48 = vstv %s733_s15  ;;  %s739_s21 = sld [smem:[#allocation7 + $0x14]] }
  0x2b   :  { %v130_v49 = vmul.f32 %v129_v48, %v119_v38  ;;  %v133_v50 = vstv %s734_s16  ;;  %s740_s22 = sld [smem:[#allocation7 + $0x15]]  ;;  %v123_v52 = vadd.f32 %v122_v44, %v106_v39  ;;  %v204_v39 = vld [vmem:[#allocation2 + $0x8] sm:$0x1] }
  0x2c   :  { %v127_v53 = vadd.f32 %v126_v47, %v110_v40  ;;  %v134_v54 = vmul.f32 %v133_v50, %v119_v38  ;;  %v138_v55 = vstv %s735_s17  ;;  %s741_s23 = sld [smem:[#allocation7 + $0x16]] }
  0x2d   :  { %v131_v56 = vadd.f32 %v130_v49, %v114_v43  ;;  %v139_v57 = vmul.f32 %v138_v55, %v136_v51  ;;  %v142_v58 = vstv %s736_s18  ;;  %s742_s24 = sld [smem:[#allocation7 + $0x17]] }
  0x2e   :  { %v135_v59 = vadd.f32 %v134_v54, %v118_v46  ;;  %v143_v60 = vmul.f32 %v142_v58, %v136_v51  ;;  %v146_v61 = vstv %s737_s19  ;;  %s743_s25 = sld [smem:[#allocation7 + $0x18]] }
  0x2f   :  { %v147_v62 = vmul.f32 %v146_v61, %v136_v51  ;;  %v150_v63 = vstv %s738_s20  ;;  %s744_s0 = sld [smem:[#allocation7 + $0x19]]  ;;  %v140_v1 = vadd.f32 %v139_v57, %v123_v52  ;;  %v221_v52 = vld [vmem:[#allocation2 + $0x9] sm:$0x1] }
  0x30   :  { %v144_v2 = vadd.f32 %v143_v60, %v127_v53  ;;  %v151_v3 = vmul.f32 %v150_v63, %v136_v51  ;;  %v155_v4 = vstv %s739_s21  ;;  %s745_s1 = sld [smem:[#allocation7 + $0x1a]] }
  0x31   :  { %v148_v5 = vadd.f32 %v147_v62, %v131_v56  ;;  %v156_v6 = vmul.f32 %v155_v4, %v153_v0  ;;  %v159_v7 = vstv %s740_s22  ;;  %s746_s26 = sld [smem:[#allocation7 + $0x1b]] }
  0x32   :  { %v152_v8 = vadd.f32 %v151_v3, %v135_v59  ;;  %v160_v9 = vmul.f32 %v159_v7, %v153_v0  ;;  %v163_v10 = vstv %s741_s23  ;;  %s747_s27 = sld [smem:[#allocation7 + $0x1c]] }
  0x33   :  { %v164_v11 = vmul.f32 %v163_v10, %v153_v0  ;;  %v167_v12 = vstv %s742_s24  ;;  %s748_s28 = sld [smem:[#allocation7 + $0x1d]]  ;;  %v157_v14 = vadd.f32 %v156_v6, %v140_v1  ;;  %v238_v1 = vld [vmem:[#allocation2 + $0xa] sm:$0x1] }
  0x34   :  { %v161_v15 = vadd.f32 %v160_v9, %v144_v2  ;;  %v168_v16 = vmul.f32 %v167_v12, %v153_v0  ;;  %v172_v17 = vstv %s743_s25  ;;  %s749_s29 = sld [smem:[#allocation7 + $0x1e]] }
  0x35   :  { %v165_v18 = vadd.f32 %v164_v11, %v148_v5  ;;  %v173_v19 = vmul.f32 %v172_v17, %v170_v13  ;;  %v176_v20 = vstv %s744_s0  ;;  %s750_s30 = sld [smem:[#allocation7 + $0x1f]] }
  0x36   :  { %v169_v21 = vadd.f32 %v168_v16, %v152_v8  ;;  %v177_v22 = vmul.f32 %v176_v20, %v170_v13  ;;  %v180_v23 = vstv %s745_s1  ;;  %s751_s4 = sld [smem:[#allocation7 + $0x20]] }
  0x37   :  { %v181_v24 = vmul.f32 %v180_v23, %v170_v13  ;;  %v184_v25 = vstv %s746_s26  ;;  %s752_s2 = sld [smem:[#allocation7 + $0x21]]  ;;  %v174_v27 = vadd.f32 %v173_v19, %v157_v14  ;;  %v255_v14 = vld [vmem:[#allocation2 + $0xb] sm:$0x1] }
  0x38   :  { %v178_v28 = vadd.f32 %v177_v22, %v161_v15  ;;  %v185_v29 = vmul.f32 %v184_v25, %v170_v13  ;;  %v189_v30 = vstv %s747_s27  ;;  %s753_s5 = sld [smem:[#allocation7 + $0x22]] }
  0x39   :  { %v182_v31 = vadd.f32 %v181_v24, %v165_v18  ;;  %v190_v32 = vmul.f32 %v189_v30, %v187_v26  ;;  %v193_v33 = vstv %s748_s28  ;;  %s754_s6 = sld [smem:[#allocation7 + $0x23]] }
  0x3a   :  { %v186_v34 = vadd.f32 %v185_v29, %v169_v21  ;;  %v194_v35 = vmul.f32 %v193_v33, %v187_v26  ;;  %v197_v36 = vstv %s749_s29  ;;  %s755_s7 = sld [smem:[#allocation7 + $0x24]] }
  0x3b   :  { %v198_v37 = vmul.f32 %v197_v36, %v187_v26  ;;  %v201_v38 = vstv %s750_s30  ;;  %s756_s8 = sld [smem:[#allocation7 + $0x25]]  ;;  %v191_v40 = vadd.f32 %v190_v32, %v174_v27  ;;  %v272_v27 = vld [vmem:[#allocation2 + $0xc] sm:$0x1] }
  0x3c   :  { %v195_v41 = vadd.f32 %v194_v35, %v178_v28  ;;  %v202_v42 = vmul.f32 %v201_v38, %v187_v26  ;;  %v206_v43 = vstv %s751_s4  ;;  %s757_s9 = sld [smem:[#allocation7 + $0x26]] }
  0x3d   :  { %v199_v44 = vadd.f32 %v198_v37, %v182_v31  ;;  %v207_v45 = vmul.f32 %v206_v43, %v204_v39  ;;  %v210_v46 = vstv %s752_s2  ;;  %s758_s10 = sld [smem:[#allocation7 + $0x27]] }
  0x3e   :  { %v203_v47 = vadd.f32 %v202_v42, %v186_v34  ;;  %v211_v48 = vmul.f32 %v210_v46, %v204_v39  ;;  %v214_v49 = vstv %s753_s5  ;;  %s759_s11 = sld [smem:[#allocation7 + $0x28]] }
  0x3f   :  { %v215_v50 = vmul.f32 %v214_v49, %v204_v39  ;;  %v218_v51 = vstv %s754_s6  ;;  %s760_s12 = sld [smem:[#allocation7 + $0x29]]  ;;  %v208_v53 = vadd.f32 %v207_v45, %v191_v40  ;;  %v289_v40 = vld [vmem:[#allocation2 + $0xd] sm:$0x1] }
  0x40   :  { %v212_v54 = vadd.f32 %v211_v48, %v195_v41  ;;  %v219_v55 = vmul.f32 %v218_v51, %v204_v39  ;;  %v223_v56 = vstv %s755_s7  ;;  %s761_s13 = sld [smem:[#allocation7 + $0x2a]] }
  0x41   :  { %v216_v57 = vadd.f32 %v215_v50, %v199_v44  ;;  %v224_v58 = vmul.f32 %v223_v56, %v221_v52  ;;  %v227_v59 = vstv %s756_s8  ;;  %s762_s14 = sld [smem:[#allocation7 + $0x2b]] }
  0x42   :  { %v220_v60 = vadd.f32 %v219_v55, %v203_v47  ;;  %v228_v61 = vmul.f32 %v227_v59, %v221_v52  ;;  %v231_v62 = vstv %s757_s9  ;;  %s763_s15 = sld [smem:[#allocation7 + $0x2c]] }
  0x43   :  { %v232_v63 = vmul.f32 %v231_v62, %v221_v52  ;;  %v235_v0 = vstv %s758_s10  ;;  %s764_s16 = sld [smem:[#allocation7 + $0x2d]]  ;;  %v225_v2 = vadd.f32 %v224_v58, %v208_v53  ;;  %v306_v53 = vld [vmem:[#allocation2 + $0xe] sm:$0x1] }
  0x44   :  { %v229_v3 = vadd.f32 %v228_v61, %v212_v54  ;;  %v236_v4 = vmul.f32 %v235_v0, %v221_v52  ;;  %v240_v5 = vstv %s759_s11  ;;  %s765_s17 = sld [smem:[#allocation7 + $0x2e]] }
  0x45   :  { %v233_v6 = vadd.f32 %v232_v63, %v216_v57  ;;  %v241_v7 = vmul.f32 %v240_v5, %v238_v1  ;;  %v244_v8 = vstv %s760_s12  ;;  %s766_s18 = sld [smem:[#allocation7 + $0x2f]] }
  0x46   :  { %v237_v9 = vadd.f32 %v236_v4, %v220_v60  ;;  %v245_v10 = vmul.f32 %v244_v8, %v238_v1  ;;  %v248_v11 = vstv %s761_s13  ;;  %s767_s19 = sld [smem:[#allocation7 + $0x30]] }
  0x47   :  { %v249_v12 = vmul.f32 %v248_v11, %v238_v1  ;;  %v252_v13 = vstv %s762_s14  ;;  %s768_s20 = sld [smem:[#allocation7 + $0x31]]  ;;  %v242_v15 = vadd.f32 %v241_v7, %v225_v2  ;;  %v323_v2 = vld [vmem:[#allocation2 + $0xf] sm:$0x1] }
  0x48   :  { %v246_v16 = vadd.f32 %v245_v10, %v229_v3  ;;  %v253_v17 = vmul.f32 %v252_v13, %v238_v1  ;;  %v257_v18 = vstv %s763_s15  ;;  %s769_s21 = sld [smem:[#allocation7 + $0x32]] }
  0x49   :  { %v250_v19 = vadd.f32 %v249_v12, %v233_v6  ;;  %v258_v20 = vmul.f32 %v257_v18, %v255_v14  ;;  %v261_v21 = vstv %s764_s16  ;;  %s770_s22 = sld [smem:[#allocation7 + $0x33]] }
  0x4a   :  { %v254_v22 = vadd.f32 %v253_v17, %v237_v9  ;;  %v262_v23 = vmul.f32 %v261_v21, %v255_v14  ;;  %v265_v24 = vstv %s765_s17  ;;  %s771_s23 = sld [smem:[#allocation7 + $0x34]] }
  0x4b   :  { %v266_v25 = vmul.f32 %v265_v24, %v255_v14  ;;  %v269_v26 = vstv %s766_s18  ;;  %s772_s24 = sld [smem:[#allocation7 + $0x35]]  ;;  %v259_v28 = vadd.f32 %v258_v20, %v242_v15  ;;  %v340_v15 = vld [vmem:[#allocation2 + $0x10] sm:$0x1] }
  0x4c   :  { %v263_v29 = vadd.f32 %v262_v23, %v246_v16  ;;  %v270_v30 = vmul.f32 %v269_v26, %v255_v14  ;;  %v274_v31 = vstv %s767_s19  ;;  %s773_s25 = sld [smem:[#allocation7 + $0x36]] }
  0x4d   :  { %v267_v32 = vadd.f32 %v266_v25, %v250_v19  ;;  %v275_v33 = vmul.f32 %v274_v31, %v272_v27  ;;  %v278_v34 = vstv %s768_s20  ;;  %s774_s0 = sld [smem:[#allocation7 + $0x37]] }
  0x4e   :  { %v271_v35 = vadd.f32 %v270_v30, %v254_v22  ;;  %v279_v36 = vmul.f32 %v278_v34, %v272_v27  ;;  %v282_v37 = vstv %s769_s21  ;;  %s775_s1 = sld [smem:[#allocation7 + $0x38]] }
  0x4f   :  { %v283_v38 = vmul.f32 %v282_v37, %v272_v27  ;;  %v286_v39 = vstv %s770_s22  ;;  %s776_s26 = sld [smem:[#allocation7 + $0x39]]  ;;  %v276_v41 = vadd.f32 %v275_v33, %v259_v28  ;;  %v357_v28 = vld [vmem:[#allocation2 + $0x11] sm:$0x1] }
  0x50   :  { %v280_v42 = vadd.f32 %v279_v36, %v263_v29  ;;  %v287_v43 = vmul.f32 %v286_v39, %v272_v27  ;;  %v291_v44 = vstv %s771_s23  ;;  %s777_s27 = sld [smem:[#allocation7 + $0x3a]] }
  0x51   :  { %v284_v45 = vadd.f32 %v283_v38, %v267_v32  ;;  %v292_v46 = vmul.f32 %v291_v44, %v289_v40  ;;  %v295_v47 = vstv %s772_s24  ;;  %s778_s28 = sld [smem:[#allocation7 + $0x3b]] }
  0x52   :  { %v288_v48 = vadd.f32 %v287_v43, %v271_v35  ;;  %v296_v49 = vmul.f32 %v295_v47, %v289_v40  ;;  %v299_v50 = vstv %s773_s25  ;;  %s779_s29 = sld [smem:[#allocation7 + $0x3c]] }
  0x53   :  { %v300_v51 = vmul.f32 %v299_v50, %v289_v40  ;;  %v303_v52 = vstv %s774_s0  ;;  %s780_s30 = sld [smem:[#allocation7 + $0x3d]]  ;;  %v293_v54 = vadd.f32 %v292_v46, %v276_v41  ;;  %v374_v41 = vld [vmem:[#allocation2 + $0x12] sm:$0x1] }
  0x54   :  { %v297_v55 = vadd.f32 %v296_v49, %v280_v42  ;;  %v304_v56 = vmul.f32 %v303_v52, %v289_v40  ;;  %v308_v57 = vstv %s775_s1  ;;  %s781_s4 = sld [smem:[#allocation7 + $0x3e]] }
  0x55   :  { %v301_v58 = vadd.f32 %v300_v51, %v284_v45  ;;  %v309_v59 = vmul.f32 %v308_v57, %v306_v53  ;;  %v312_v60 = vstv %s776_s26  ;;  %s782_s2 = sld [smem:[#allocation7 + $0x3f]] }
  0x56   :  { %v305_v61 = vadd.f32 %v304_v56, %v288_v48  ;;  %v313_v62 = vmul.f32 %v312_v60, %v306_v53  ;;  %v316_v63 = vstv %s777_s27  ;;  %s783_s5 = sld [smem:[#allocation7 + $0x40]] }
  0x57   :  { %v317_v0 = vmul.f32 %v316_v63, %v306_v53  ;;  %v320_v1 = vstv %s778_s28  ;;  %s784_s6 = sld [smem:[#allocation7 + $0x41]]  ;;  %v310_v3 = vadd.f32 %v309_v59, %v293_v54  ;;  %v391_v54 = vld [vmem:[#allocation2 + $0x13] sm:$0x1] }
  0x58   :  { %v314_v4 = vadd.f32 %v313_v62, %v297_v55  ;;  %v321_v5 = vmul.f32 %v320_v1, %v306_v53  ;;  %v325_v6 = vstv %s779_s29  ;;  %s785_s7 = sld [smem:[#allocation7 + $0x42]] }
  0x59   :  { %v318_v7 = vadd.f32 %v317_v0, %v301_v58  ;;  %v326_v8 = vmul.f32 %v325_v6, %v323_v2  ;;  %v329_v9 = vstv %s780_s30  ;;  %s786_s8 = sld [smem:[#allocation7 + $0x43]] }
  0x5a   :  { %v322_v10 = vadd.f32 %v321_v5, %v305_v61  ;;  %v330_v11 = vmul.f32 %v329_v9, %v323_v2  ;;  %v333_v12 = vstv %s781_s4  ;;  %s787_s9 = sld [smem:[#allocation7 + $0x44]] }
  0x5b   :  { %v334_v13 = vmul.f32 %v333_v12, %v323_v2  ;;  %v337_v14 = vstv %s782_s2  ;;  %s788_s10 = sld [smem:[#allocation7 + $0x45]]  ;;  %v327_v16 = vadd.f32 %v326_v8, %v310_v3  ;;  %v408_v3 = vld [vmem:[#allocation2 + $0x14] sm:$0x1] }
  0x5c   :  { %v331_v17 = vadd.f32 %v330_v11, %v314_v4  ;;  %v338_v18 = vmul.f32 %v337_v14, %v323_v2  ;;  %v342_v19 = vstv %s783_s5  ;;  %s789_s11 = sld [smem:[#allocation7 + $0x46]] }
  0x5d   :  { %v335_v20 = vadd.f32 %v334_v13, %v318_v7  ;;  %v343_v21 = vmul.f32 %v342_v19, %v340_v15  ;;  %v346_v22 = vstv %s784_s6  ;;  %s790_s12 = sld [smem:[#allocation7 + $0x47]] }
  0x5e   :  { %v339_v23 = vadd.f32 %v338_v18, %v322_v10  ;;  %v347_v24 = vmul.f32 %v346_v22, %v340_v15  ;;  %v350_v25 = vstv %s785_s7  ;;  %s791_s13 = sld [smem:[#allocation7 + $0x48]] }
  0x5f   :  { %v351_v26 = vmul.f32 %v350_v25, %v340_v15  ;;  %v354_v27 = vstv %s786_s8  ;;  %s792_s14 = sld [smem:[#allocation7 + $0x49]]  ;;  %v344_v29 = vadd.f32 %v343_v21, %v327_v16  ;;  %v425_v16 = vld [vmem:[#allocation2 + $0x15] sm:$0x1] }
  0x60   :  { %v348_v30 = vadd.f32 %v347_v24, %v331_v17  ;;  %v355_v31 = vmul.f32 %v354_v27, %v340_v15  ;;  %v359_v32 = vstv %s787_s9  ;;  %s793_s15 = sld [smem:[#allocation7 + $0x4a]] }
  0x61   :  { %v352_v33 = vadd.f32 %v351_v26, %v335_v20  ;;  %v360_v34 = vmul.f32 %v359_v32, %v357_v28  ;;  %v363_v35 = vstv %s788_s10  ;;  %s794_s16 = sld [smem:[#allocation7 + $0x4b]] }
  0x62   :  { %v356_v36 = vadd.f32 %v355_v31, %v339_v23  ;;  %v364_v37 = vmul.f32 %v363_v35, %v357_v28  ;;  %v367_v38 = vstv %s789_s11  ;;  %s795_s17 = sld [smem:[#allocation7 + $0x4c]] }
  0x63   :  { %v368_v39 = vmul.f32 %v367_v38, %v357_v28  ;;  %v371_v40 = vstv %s790_s12  ;;  %s796_s18 = sld [smem:[#allocation7 + $0x4d]]  ;;  %v361_v42 = vadd.f32 %v360_v34, %v344_v29  ;;  %v442_v29 = vld [vmem:[#allocation2 + $0x16] sm:$0x1] }
  0x64   :  { %v365_v43 = vadd.f32 %v364_v37, %v348_v30  ;;  %v372_v44 = vmul.f32 %v371_v40, %v357_v28  ;;  %v376_v45 = vstv %s791_s13  ;;  %s797_s19 = sld [smem:[#allocation7 + $0x4e]] }
  0x65   :  { %v369_v46 = vadd.f32 %v368_v39, %v352_v33  ;;  %v377_v47 = vmul.f32 %v376_v45, %v374_v41  ;;  %v380_v48 = vstv %s792_s14  ;;  %s798_s20 = sld [smem:[#allocation7 + $0x4f]] }
  0x66   :  { %v373_v49 = vadd.f32 %v372_v44, %v356_v36  ;;  %v381_v50 = vmul.f32 %v380_v48, %v374_v41  ;;  %v384_v51 = vstv %s793_s15  ;;  %s799_s21 = sld [smem:[#allocation7 + $0x50]] }
  0x67   :  { %v385_v52 = vmul.f32 %v384_v51, %v374_v41  ;;  %v388_v53 = vstv %s794_s16  ;;  %s800_s22 = sld [smem:[#allocation7 + $0x51]]  ;;  %v378_v55 = vadd.f32 %v377_v47, %v361_v42  ;;  %v459_v42 = vld [vmem:[#allocation2 + $0x17] sm:$0x1] }
  0x68   :  { %v382_v56 = vadd.f32 %v381_v50, %v365_v43  ;;  %v389_v57 = vmul.f32 %v388_v53, %v374_v41  ;;  %v393_v58 = vstv %s795_s17  ;;  %s801_s23 = sld [smem:[#allocation7 + $0x52]] }
  0x69   :  { %v386_v59 = vadd.f32 %v385_v52, %v369_v46  ;;  %v394_v60 = vmul.f32 %v393_v58, %v391_v54  ;;  %v397_v61 = vstv %s796_s18  ;;  %s802_s24 = sld [smem:[#allocation7 + $0x53]] }
  0x6a   :  { %v390_v62 = vadd.f32 %v389_v57, %v373_v49  ;;  %v398_v63 = vmul.f32 %v397_v61, %v391_v54  ;;  %v401_v0 = vstv %s797_s19  ;;  %s803_s25 = sld [smem:[#allocation7 + $0x54]] }
  0x6b   :  { %v402_v1 = vmul.f32 %v401_v0, %v391_v54  ;;  %v405_v2 = vstv %s798_s20  ;;  %s804_s0 = sld [smem:[#allocation7 + $0x55]]  ;;  %v395_v4 = vadd.f32 %v394_v60, %v378_v55  ;;  %v476_v55 = vld [vmem:[#allocation2 + $0x18] sm:$0x1] }
  0x6c   :  { %v399_v5 = vadd.f32 %v398_v63, %v382_v56  ;;  %v406_v6 = vmul.f32 %v405_v2, %v391_v54  ;;  %v410_v7 = vstv %s799_s21  ;;  %s805_s1 = sld [smem:[#allocation7 + $0x56]] }
  0x6d   :  { %v403_v8 = vadd.f32 %v402_v1, %v386_v59  ;;  %v411_v9 = vmul.f32 %v410_v7, %v408_v3  ;;  %v414_v10 = vstv %s800_s22  ;;  %s806_s26 = sld [smem:[#allocation7 + $0x57]] }
  0x6e   :  { %v407_v11 = vadd.f32 %v406_v6, %v390_v62  ;;  %v415_v12 = vmul.f32 %v414_v10, %v408_v3  ;;  %v418_v13 = vstv %s801_s23  ;;  %s807_s27 = sld [smem:[#allocation7 + $0x58]] }
  0x6f   :  { %v419_v14 = vmul.f32 %v418_v13, %v408_v3  ;;  %v422_v15 = vstv %s802_s24  ;;  %s808_s28 = sld [smem:[#allocation7 + $0x59]]  ;;  %v412_v17 = vadd.f32 %v411_v9, %v395_v4  ;;  %v493_v4 = vld [vmem:[#allocation2 + $0x19] sm:$0x1] }
  0x70   :  { %v416_v18 = vadd.f32 %v415_v12, %v399_v5  ;;  %v423_v19 = vmul.f32 %v422_v15, %v408_v3  ;;  %v427_v20 = vstv %s803_s25  ;;  %s809_s29 = sld [smem:[#allocation7 + $0x5a]] }
  0x71   :  { %v420_v21 = vadd.f32 %v419_v14, %v403_v8  ;;  %v428_v22 = vmul.f32 %v427_v20, %v425_v16  ;;  %v431_v23 = vstv %s804_s0  ;;  %s810_s30 = sld [smem:[#allocation7 + $0x5b]] }
  0x72   :  { %v424_v24 = vadd.f32 %v423_v19, %v407_v11  ;;  %v432_v25 = vmul.f32 %v431_v23, %v425_v16  ;;  %v435_v26 = vstv %s805_s1  ;;  %s811_s4 = sld [smem:[#allocation7 + $0x5c]] }
  0x73   :  { %v436_v27 = vmul.f32 %v435_v26, %v425_v16  ;;  %v439_v28 = vstv %s806_s26  ;;  %s812_s2 = sld [smem:[#allocation7 + $0x5d]]  ;;  %v429_v30 = vadd.f32 %v428_v22, %v412_v17  ;;  %v510_v17 = vld [vmem:[#allocation2 + $0x1a] sm:$0x1] }
  0x74   :  { %v433_v31 = vadd.f32 %v432_v25, %v416_v18  ;;  %v440_v32 = vmul.f32 %v439_v28, %v425_v16  ;;  %v444_v33 = vstv %s807_s27  ;;  %s813_s5 = sld [smem:[#allocation7 + $0x5e]] }
  0x75   :  { %v437_v34 = vadd.f32 %v436_v27, %v420_v21  ;;  %v445_v35 = vmul.f32 %v444_v33, %v442_v29  ;;  %v448_v36 = vstv %s808_s28  ;;  %s814_s6 = sld [smem:[#allocation7 + $0x5f]] }
  0x76   :  { %v441_v37 = vadd.f32 %v440_v32, %v424_v24  ;;  %v449_v38 = vmul.f32 %v448_v36, %v442_v29  ;;  %v452_v39 = vstv %s809_s29  ;;  %s815_s7 = sld [smem:[#allocation7 + $0x60]] }
  0x77   :  { %v453_v40 = vmul.f32 %v452_v39, %v442_v29  ;;  %v456_v41 = vstv %s810_s30  ;;  %s816_s8 = sld [smem:[#allocation7 + $0x61]]  ;;  %v446_v43 = vadd.f32 %v445_v35, %v429_v30  ;;  %v527_v30 = vld [vmem:[#allocation2 + $0x1b] sm:$0x1] }
  0x78   :  { %v450_v44 = vadd.f32 %v449_v38, %v433_v31  ;;  %v457_v45 = vmul.f32 %v456_v41, %v442_v29  ;;  %v461_v46 = vstv %s811_s4  ;;  %s817_s9 = sld [smem:[#allocation7 + $0x62]] }
  0x79   :  { %v454_v47 = vadd.f32 %v453_v40, %v437_v34  ;;  %v462_v48 = vmul.f32 %v461_v46, %v459_v42  ;;  %v465_v49 = vstv %s812_s2  ;;  %s818_s10 = sld [smem:[#allocation7 + $0x63]] }
  0x7a   :  { %v458_v50 = vadd.f32 %v457_v45, %v441_v37  ;;  %v466_v51 = vmul.f32 %v465_v49, %v459_v42  ;;  %v469_v52 = vstv %s813_s5  ;;  %s819_s11 = sld [smem:[#allocation7 + $0x64]] }
  0x7b   :  { %v470_v53 = vmul.f32 %v469_v52, %v459_v42  ;;  %v473_v54 = vstv %s814_s6  ;;  %s820_s12 = sld [smem:[#allocation7 + $0x65]]  ;;  %v463_v56 = vadd.f32 %v462_v48, %v446_v43  ;;  %v544_v43 = vld [vmem:[#allocation2 + $0x1c] sm:$0x1] }
  0x7c   :  { %v467_v57 = vadd.f32 %v466_v51, %v450_v44  ;;  %v474_v58 = vmul.f32 %v473_v54, %v459_v42  ;;  %v478_v59 = vstv %s815_s7  ;;  %s821_s13 = sld [smem:[#allocation7 + $0x66]] }
  0x7d   :  { %v471_v60 = vadd.f32 %v470_v53, %v454_v47  ;;  %v479_v61 = vmul.f32 %v478_v59, %v476_v55  ;;  %v482_v62 = vstv %s816_s8  ;;  %s822_s14 = sld [smem:[#allocation7 + $0x67]] }
  0x7e   :  { %v475_v63 = vadd.f32 %v474_v58, %v458_v50  ;;  %v483_v0 = vmul.f32 %v482_v62, %v476_v55  ;;  %v486_v1 = vstv %s817_s9  ;;  %s823_s15 = sld [smem:[#allocation7 + $0x68]] }
  0x7f   :  { %v487_v2 = vmul.f32 %v486_v1, %v476_v55  ;;  %v490_v3 = vstv %s818_s10  ;;  %s824_s16 = sld [smem:[#allocation7 + $0x69]]  ;;  %v480_v5 = vadd.f32 %v479_v61, %v463_v56  ;;  %v561_v56 = vld [vmem:[#allocation2 + $0x1d] sm:$0x1] }
  0x80   :  { %v484_v6 = vadd.f32 %v483_v0, %v467_v57  ;;  %v491_v7 = vmul.f32 %v490_v3, %v476_v55  ;;  %v495_v8 = vstv %s819_s11  ;;  %s825_s17 = sld [smem:[#allocation7 + $0x6a]] }
  0x81   :  { %v488_v9 = vadd.f32 %v487_v2, %v471_v60  ;;  %v496_v10 = vmul.f32 %v495_v8, %v493_v4  ;;  %v499_v11 = vstv %s820_s12  ;;  %s826_s18 = sld [smem:[#allocation7 + $0x6b]] }
  0x82   :  { %v492_v12 = vadd.f32 %v491_v7, %v475_v63  ;;  %v500_v13 = vmul.f32 %v499_v11, %v493_v4  ;;  %v503_v14 = vstv %s821_s13  ;;  %s827_s19 = sld [smem:[#allocation7 + $0x6c]] }
  0x83   :  { %v504_v15 = vmul.f32 %v503_v14, %v493_v4  ;;  %v507_v16 = vstv %s822_s14  ;;  %s828_s20 = sld [smem:[#allocation7 + $0x6d]]  ;;  %v497_v18 = vadd.f32 %v496_v10, %v480_v5  ;;  %v578_v5 = vld [vmem:[#allocation2 + $0x1e] sm:$0x1] }
  0x84   :  { %v501_v19 = vadd.f32 %v500_v13, %v484_v6  ;;  %v508_v20 = vmul.f32 %v507_v16, %v493_v4  ;;  %v512_v21 = vstv %s823_s15  ;;  %s829_s21 = sld [smem:[#allocation7 + $0x6e]] }
  0x85   :  { %v505_v22 = vadd.f32 %v504_v15, %v488_v9  ;;  %v513_v23 = vmul.f32 %v512_v21, %v510_v17  ;;  %v516_v24 = vstv %s824_s16  ;;  %s830_s22 = sld [smem:[#allocation7 + $0x6f]] }
  0x86   :  { %v509_v25 = vadd.f32 %v508_v20, %v492_v12  ;;  %v517_v26 = vmul.f32 %v516_v24, %v510_v17  ;;  %v520_v27 = vstv %s825_s17  ;;  %s831_s23 = sld [smem:[#allocation7 + $0x70]] }
  0x87   :  { %v521_v28 = vmul.f32 %v520_v27, %v510_v17  ;;  %v524_v29 = vstv %s826_s18  ;;  %s832_s24 = sld [smem:[#allocation7 + $0x71]]  ;;  %v514_v31 = vadd.f32 %v513_v23, %v497_v18  ;;  %v595_v18 = vld [vmem:[#allocation2 + $0x1f] sm:$0x1] }
  0x88   :  { %v518_v32 = vadd.f32 %v517_v26, %v501_v19  ;;  %v525_v33 = vmul.f32 %v524_v29, %v510_v17  ;;  %v529_v34 = vstv %s827_s19  ;;  %s833_s25 = sld [smem:[#allocation7 + $0x72]] }
  0x89   :  { %v522_v35 = vadd.f32 %v521_v28, %v505_v22  ;;  %v530_v36 = vmul.f32 %v529_v34, %v527_v30  ;;  %v533_v37 = vstv %s828_s20  ;;  %s834_s0 = sld [smem:[#allocation7 + $0x73]] }
  0x8a   :  { %v526_v38 = vadd.f32 %v525_v33, %v509_v25  ;;  %v534_v39 = vmul.f32 %v533_v37, %v527_v30  ;;  %v537_v40 = vstv %s829_s21  ;;  %s835_s1 = sld [smem:[#allocation7 + $0x74]] }
  0x8b   :  { %v538_v41 = vmul.f32 %v537_v40, %v527_v30  ;;  %v541_v42 = vstv %s830_s22  ;;  %s836_s26 = sld [smem:[#allocation7 + $0x75]]  ;;  %v531_v44 = vadd.f32 %v530_v36, %v514_v31  ;;  %v612_v31 = vld [vmem:[#allocation2 + $0x20] sm:$0x1] }
  0x8c   :  { %v535_v45 = vadd.f32 %v534_v39, %v518_v32  ;;  %v542_v46 = vmul.f32 %v541_v42, %v527_v30  ;;  %v546_v47 = vstv %s831_s23  ;;  %s837_s27 = sld [smem:[#allocation7 + $0x76]] }
  0x8d   :  { %v539_v48 = vadd.f32 %v538_v41, %v522_v35  ;;  %v547_v49 = vmul.f32 %v546_v47, %v544_v43  ;;  %v550_v50 = vstv %s832_s24  ;;  %s838_s28 = sld [smem:[#allocation7 + $0x77]] }
  0x8e   :  { %v543_v51 = vadd.f32 %v542_v46, %v526_v38  ;;  %v551_v52 = vmul.f32 %v550_v50, %v544_v43  ;;  %v554_v53 = vstv %s833_s25  ;;  %s839_s29 = sld [smem:[#allocation7 + $0x78]]  ;;  %s954_s25 = smov [#allocation9]  }
  0x8f   :  { %v555_v54 = vmul.f32 %v554_v53, %v544_v43  ;;  %v558_v55 = vstv %s834_s0  ;;  %s840_s30 = sld [smem:[#allocation7 + $0x79]]  ;;  %v548_v57 = vadd.f32 %v547_v49, %v531_v44  ;;  %v629_v44 = vld [vmem:[#allocation2 + $0x21] sm:$0x1]  ;;  %s703_s0 = sshll.u32 %s954_s25, 4  ;;  %s704_s0 = int_to_ptr.vmem [resolvable:$true] %s703_s0 }
  0x90   :  { %v552_v58 = vadd.f32 %v551_v52, %v535_v45  ;;  %v559_v59 = vmul.f32 %v558_v55, %v544_v43  ;;  %v563_v60 = vstv %s835_s1  ;;  %s841_s4 = sld [smem:[#allocation7 + $0x7a]] }
  0x91   :  { %v556_v61 = vadd.f32 %v555_v54, %v539_v48  ;;  %v564_v62 = vmul.f32 %v563_v60, %v561_v56  ;;  %v567_v63 = vstv %s836_s26  ;;  %s842_s2 = sld [smem:[#allocation7 + $0x7b]] }
  0x92   :  { %v560_v0 = vadd.f32 %v559_v59, %v543_v51  ;;  %v568_v1 = vmul.f32 %v567_v63, %v561_v56  ;;  %v571_v2 = vstv %s837_s27  ;;  %s843_s5 = sld [smem:[#allocation7 + $0x7c]]  ;;  %s705_s27 = sshll.u32 %s993_s3, 4  ;;  %s706_s27 = int_to_ptr.hbm [resolvable:$true] %s705_s27 }
  0x93   :  { %v572_v3 = vmul.f32 %v571_v2, %v561_v56  ;;  %v575_v4 = vstv %s838_s28  ;;  %s844_s6 = sld [smem:[#allocation7 + $0x7d]]  ;;  %v565_v6 = vadd.f32 %v564_v62, %v548_v57  ;;  %v646_v57 = vld [vmem:[#allocation2 + $0x22] sm:$0x1] }
  0x94   :  { %v569_v7 = vadd.f32 %v568_v1, %v552_v58  ;;  %v576_v8 = vmul.f32 %v575_v4, %v561_v56  ;;  %v580_v9 = vstv %s839_s29  ;;  %s845_s7 = sld [smem:[#allocation7 + $0x7e]] }
  0x95   :  { %v573_v10 = vadd.f32 %v572_v3, %v556_v61  ;;  %v581_v11 = vmul.f32 %v580_v9, %v578_v5  ;;  %v584_v12 = vstv %s840_s30  ;;  %s846_s8 = sld [smem:[#allocation7 + $0x7f]] }
  0x96   :  { %v577_v13 = vadd.f32 %v576_v8, %v560_v0  ;;  %v585_v14 = vmul.f32 %v584_v12, %v578_v5  ;;  %v588_v15 = vstv %s841_s4  ;;  %s847_s9 = sld [smem:[#allocation7 + $0x80]] }
  0x97   :  { %v589_v16 = vmul.f32 %v588_v15, %v578_v5  ;;  %v592_v17 = vstv %s842_s2  ;;  %s848_s10 = sld [smem:[#allocation7 + $0x81]]  ;;  %v582_v19 = vadd.f32 %v581_v11, %v565_v6  ;;  %v663_v6 = vld [vmem:[#allocation2 + $0x23] sm:$0x1] }
  0x98   :  { %v586_v20 = vadd.f32 %v585_v14, %v569_v7  ;;  %v593_v21 = vmul.f32 %v592_v17, %v578_v5  ;;  %v597_v22 = vstv %s843_s5  ;;  %s849_s11 = sld [smem:[#allocation7 + $0x82]] }
  0x99   :  { %v590_v23 = vadd.f32 %v589_v16, %v573_v10  ;;  %v598_v24 = vmul.f32 %v597_v22, %v595_v18  ;;  %v601_v25 = vstv %s844_s6  ;;  %s850_s12 = sld [smem:[#allocation7 + $0x83]] }
  0x9a   :  { %v594_v26 = vadd.f32 %v593_v21, %v577_v13  ;;  %v602_v27 = vmul.f32 %v601_v25, %v595_v18  ;;  %v605_v28 = vstv %s845_s7  ;;  %s851_s13 = sld [smem:[#allocation7 + $0x84]] }
  0x9b   :  { %v606_v29 = vmul.f32 %v605_v28, %v595_v18  ;;  %v609_v30 = vstv %s846_s8  ;;  %s852_s14 = sld [smem:[#allocation7 + $0x85]]  ;;  %v599_v32 = vadd.f32 %v598_v24, %v582_v19 }
  0x9c   :  { %v603_v33 = vadd.f32 %v602_v27, %v586_v20  ;;  %v610_v34 = vmul.f32 %v609_v30, %v595_v18  ;;  %v614_v35 = vstv %s847_s9  ;;  %s853_s15 = sld [smem:[#allocation7 + $0x86]] }
  0x9d   :  { %v607_v36 = vadd.f32 %v606_v29, %v590_v23  ;;  %v615_v37 = vmul.f32 %v614_v35, %v612_v31  ;;  %v618_v38 = vstv %s848_s10  ;;  %s854_s16 = sld [smem:[#allocation7 + $0x87]] }
  0x9e   :  { %v611_v39 = vadd.f32 %v610_v34, %v594_v26  ;;  %v619_v40 = vmul.f32 %v618_v38, %v612_v31  ;;  %v622_v41 = vstv %s849_s11  ;;  %s855_s17 = sld [smem:[#allocation7 + $0x88]] }
  0x9f   :  { %v623_v42 = vmul.f32 %v622_v41, %v612_v31  ;;  %v626_v43 = vstv %s850_s12  ;;  %s856_s18 = sld [smem:[#allocation7 + $0x89]]  ;;  %v616_v45 = vadd.f32 %v615_v37, %v599_v32 }
  0xa0   :  { %v620_v46 = vadd.f32 %v619_v40, %v603_v33  ;;  %v627_v47 = vmul.f32 %v626_v43, %v612_v31  ;;  %v631_v48 = vstv %s851_s13  ;;  %s857_s19 = sld [smem:[#allocation7 + $0x8a]] }
  0xa1   :  { %v624_v49 = vadd.f32 %v623_v42, %v607_v36  ;;  %v632_v50 = vmul.f32 %v631_v48, %v629_v44  ;;  %v635_v51 = vstv %s852_s14  ;;  %s858_s20 = sld [smem:[#allocation7 + $0x8b]] }
  0xa2   :  { %v628_v52 = vadd.f32 %v627_v47, %v611_v39  ;;  %v636_v53 = vmul.f32 %v635_v51, %v629_v44  ;;  %v639_v54 = vstv %s853_s15  ;;  %s859_s21 = sld [smem:[#allocation7 + $0x8c]] }
  0xa3   :  { %v640_v55 = vmul.f32 %v639_v54, %v629_v44  ;;  %v643_v56 = vstv %s854_s16  ;;  %s860_s22 = sld [smem:[#allocation7 + $0x8d]]  ;;  %v633_v58 = vadd.f32 %v632_v50, %v616_v45 }
  0xa4   :  { %v637_v59 = vadd.f32 %v636_v53, %v620_v46  ;;  %v644_v60 = vmul.f32 %v643_v56, %v629_v44  ;;  %v648_v61 = vstv %s855_s17  ;;  %s861_s23 = sld [smem:[#allocation7 + $0x8e]] }
  0xa5   :  { %v641_v62 = vadd.f32 %v640_v55, %v624_v49  ;;  %v649_v63 = vmul.f32 %v648_v61, %v646_v57  ;;  %v652_v0 = vstv %s856_s18  ;;  %s862_s24 = sld [smem:[#allocation7 + $0x8f]] }
  0xa6   :  { %v645_v1 = vadd.f32 %v644_v60, %v628_v52  ;;  %v653_v2 = vmul.f32 %v652_v0, %v646_v57  ;;  %v656_v3 = vstv %s857_s19 }
  0xa7   :  { %v657_v4 = vmul.f32 %v656_v3, %v646_v57  ;;  %v660_v5 = vstv %s858_s20  ;;  %v650_v7 = vadd.f32 %v649_v63, %v633_v58 }
  0xa8   :  { %v654_v8 = vadd.f32 %v653_v2, %v637_v59  ;;  %v661_v9 = vmul.f32 %v660_v5, %v646_v57  ;;  %v665_v10 = vstv %s859_s21 }
  0xa9   :  { %v658_v11 = vadd.f32 %v657_v4, %v641_v62  ;;  %v666_v12 = vmul.f32 %v665_v10, %v663_v6  ;;  %v669_v13 = vstv %s860_s22 }
  0xaa   :  { %v662_v14 = vadd.f32 %v661_v9, %v645_v1  ;;  %v670_v15 = vmul.f32 %v669_v13, %v663_v6  ;;  %v673_v16 = vstv %s861_s23 }
  0xab   :  { %v674_v17 = vmul.f32 %v673_v16, %v663_v6  ;;  %v677_v18 = vstv %s862_s24  ;;  %v667_v19 = vadd.f32 %v666_v12, %v650_v7 }
  0xac   :  { %v671_v20 = vadd.f32 %v670_v15, %v654_v8  ;;  %v678_v21 = vmul.f32 %v677_v18, %v663_v6 }
  0xad   :  { %v675_v22 = vadd.f32 %v674_v17, %v658_v11 }
  0xae   :  { %v679_v23 = vadd.f32 %v678_v21, %v662_v14  ;;  %v681_v24 = vrot.slane %v671_v20, 7 }
  0xaf   :  { %v684_v25 = vrot.slane %v675_v22, 6 }
  0xb0   :  { %v687_v26 = vrot.slane %v679_v23, 5  ;;  %v690_v27 = vsel %vm689_vm0, %v667_v19, %v681_v24 }
  0xb1   :  { %v692_v28 = vsel %vm691_vm1, %v690_v27, %v684_v25 }
  0xb2   :  { %v694_v29 = vsel %vm693_vm2, %v692_v28, %v687_v26 }
  0xb3   :  { %v695_v30 = vmul.f32 0.01, %v694_v29 }
  0xb5   :  { %v696_v31 = vmax.f32 %v694_v29, %v695_v30 }
  0xb7   :  { %697 = vst [vmem:[#allocation9] sm:$0xf] %v696_v31 }
  0xb8   :  { %708 = dma.vmem_to_hbm [thread:$0]  %s704_s0, 64, %s706_s27, [#allocation4]  }
  0xb9   :  { %947 = dma.done.wait [#allocation4], 64  }
  0xba   :  { %948 = vsyncadd [#allocation4], 4294967232 }
  0xbb   :  { %713 = vsyncpa [#allocation3], 1 }
  0xbc   :  { %714 = vsyncpa [#allocation4], 1 }
  0xbd   :  { %715 = vsyncpa [#allocation5], 1 }
  0xbe   :  { %716 = vsyncpa [#allocation6], 1 }

</bundles_post_ra>
